<compile_context>
chip_gen: v5e
topology: v5e:2x2
jax: 0.10.0
libtpu: 0.0.40
codegen_flags: <defaults>
</compile_context>

<pallas_src>
import jax
import jax.numpy as jnp
from jax import lax
from jax.experimental import pallas as pl
from jax.experimental.pallas import tpu as pltpu


# ------------------------------- Pallas kernel -------------------------------

def _self_attn_kernel(xq_ref, x_ref, mt_ref, gwv_ref, o_ref):
    """Fused self_attn forward for one (batch, query-chunk) grid step.

    xq_ref : (1, C, TL) query / residual chunk of the flattened NCHW input
    x_ref  : (1, C, L)  full flattened input (keys / values), L = H*W
    mt_ref : (C, C)     Mt = Wk^T @ Wq   (query + key 1x1 convs folded)
    gwv_ref: (C, C)     gamma * Wv       (value 1x1 conv, gamma folded in)
    o_ref  : (1, C, TL) gamma * attention_out + x   (chunk)
    """
    xq = xq_ref[0].astype(jnp.float32)                                   # (C, TL)
    x = x_ref[0].astype(jnp.float32)                                     # (C, L)
    # Query-side projection with key weights folded in: xm = (Wk^T Wq) @ x_q.
    xm = jnp.dot(mt_ref[...], xq, preferred_element_type=jnp.float32)    # (C, TL)
    # Transposed logits: sT[k, l] = sum_c x[c, k] * xm[c, l]  (== attn_map[l, k]).
    s_t = lax.dot_general(x, xm, (((0,), (0,)), ((), ())),
                          preferred_element_type=jnp.float32)            # (L, TL)
    attn_t = jax.nn.sigmoid(s_t)                                         # (L, TL)
    # Value projection with gamma pre-folded: v = (gamma * Wv) @ x.
    v = jnp.dot(gwv_ref[...], x, preferred_element_type=jnp.float32)     # (C, L)
    # out[c, l] = sum_k v[c, k] * attn[l, k]  ->  standard (C,L) @ (L,TL) matmul.
    out = jnp.dot(v, attn_t, preferred_element_type=jnp.float32)         # (C, TL)
    o_ref[...] = (out + xq)[None].astype(o_ref.dtype)


# ------------------------------- Python wrapper -------------------------------

def _pick_query_tile(L):
    """Largest lane-friendly query tile: full L when small, else 256 / 128."""
    if L <= 256:
        return L
    for t in (256, 128):
        if L % t == 0:
            return t
    return L


def self_attn_forward(x_nchw, wq, wk, wv, gamma, mode='hw'):
    """self_attn.forward.  wq/wk: (C//8, C), wv: (C, C), gamma: (1,) or scalar."""
    B, C, H, W = x_nchw.shape
    axis = 1
    if 'h' in mode:
        axis *= H
    if 'w' in mode:
        axis *= W
    if axis != H * W:
        # TODO(synk): mode='h' / mode='w' use a .view(B, -1, axis) that
        # interleaves channel and spatial indices; only the module's default
        # mode='hw' is fused here.
        raise NotImplementedError("only mode='hw' is implemented")
    L = H * W
    tl = _pick_query_tile(L)

    # torch .contiguous().view(B, -1, H*W) on NCHW data == a free reshape.
    x_flat = x_nchw.reshape(B, C, L)
    # Fold the query & key 1x1 convs: attn_logits = x^T (Wq^T Wk) x, so with
    # Mt = Wk^T @ Wq we have attn_logits[l, k] = sum_c x[c, k] * (Mt x)[c, l].
    mt = jnp.dot(wk.T, wq, preferred_element_type=jnp.float32).astype(jnp.float32)
    # Fold gamma into the value weight: gamma*(Wv x)@attn^T == ((gamma Wv) x)@attn^T.
    gwv = (jnp.asarray(gamma, jnp.float32) * wv).astype(jnp.float32)

    out_flat = pl.pallas_call(
        _self_attn_kernel,
        out_shape=jax.ShapeDtypeStruct((B, C, L), x_nchw.dtype),
        grid=(B, L // tl),
        in_specs=[
            pl.BlockSpec((1, C, tl), lambda b, j: (b, 0, j)),   # query/residual chunk
            pl.BlockSpec((1, C, L), lambda b, j: (b, 0, 0)),    # full keys / values
            pl.BlockSpec((C, C), lambda b, j: (0, 0)),          # Wk^T Wq
            pl.BlockSpec((C, C), lambda b, j: (0, 0)),          # gamma * Wv
        ],
        out_specs=pl.BlockSpec((1, C, tl), lambda b, j: (b, 0, j)),
        compiler_params=pltpu.CompilerParams(
            dimension_semantics=("parallel", "parallel")),
    )(x_flat, x_flat, mt, gwv)
    return out_flat.reshape(B, C, H, W)


# ----------------------------- plain-JAX reference ----------------------------

def reference_self_attn(x, wq, wk, wv, gamma, mode='hw'):
    B, C, H, W = x.shape
    axis = 1
    if 'h' in mode:
        axis *= H
    if 'w' in mode:
        axis *= W

    def conv1x1(a, w):
        return jnp.einsum('oc,bchw->bohw', w, a)

    pq = conv1x1(x, wq).reshape(B, -1, axis).transpose(0, 2, 1)    # (B, L, Cq)
    pk = conv1x1(x, wk).reshape(B, -1, axis)                       # (B, Cq, L)
    attn = jax.nn.sigmoid(jnp.einsum('bln,bnm->blm', pq, pk))      # (B, L, L)
    pv = conv1x1(x, wv).reshape(B, -1, axis)                       # (B, C, L)
    out = jnp.einsum('bnk,blk->bnl', pv, attn).reshape(B, C, H, W)
    return gamma * out + x


# ------------------------------------ main ------------------------------------

if __name__ == "__main__":
    key = jax.random.PRNGKey(0)
    fwd = jax.jit(self_attn_forward, static_argnames=('mode',))

    # Two spatial sizes so both grid layouts are exercised:
    #   16x16 -> L=256, single query tile;  32x32 -> L=1024, 4 query tiles.
    for case, (B, C, H, W) in enumerate([(2, 16, 16, 16), (2, 16, 32, 32)]):
        ks = jax.random.split(jax.random.fold_in(key, case), 4)
        Cq = C // 8
        scale = 0.1
        wq = scale * jax.random.normal(ks[0], (Cq, C), jnp.float32)
        wk = scale * jax.random.normal(ks[1], (Cq, C), jnp.float32)
        wv = scale * jax.random.normal(ks[2], (C, C), jnp.float32)
        # PyTorch initializes gamma to 0 (output == input); use a nonzero value
        # so the attention path is actually exercised (still deterministic).
        gamma = jnp.full((1,), 0.1, jnp.float32)
        x = jax.random.normal(ks[3], (B, C, H, W), jnp.float32)

        out = jax.block_until_ready(fwd(x, wq, wk, wv, gamma))
        ref = jax.block_until_ready(reference_self_attn(x, wq, wk, wv, gamma))

        assert out.shape == (B, C, H, W), out.shape
        max_err = float(jnp.max(jnp.abs(out - ref)))
        assert jnp.allclose(out, ref, atol=5e-2, rtol=5e-2), (case, max_err)

    print("KERNEL_OK")
</pallas_src>

<mosaic_0001>
module attributes {stable_mosaic.version = 11 : i64} {
  func.func @_self_attn_kernel(%arg0: i32, %arg1: i32, %arg2: memref<1x16x256xf32, #tpu.memory_space<vmem>>, %arg3: memref<1x16x256xf32, #tpu.memory_space<vmem>>, %arg4: memref<16x16xf32, #tpu.memory_space<vmem>>, %arg5: memref<16x16xf32, #tpu.memory_space<vmem>>, %arg6: memref<1x16x256xf32, #tpu.memory_space<vmem>>) attributes {dimension_semantics = [#tpu.dimension_semantics<parallel>, #tpu.dimension_semantics<parallel>], iteration_bounds = array<i64: 2, 1>, scalar_prefetch = 0 : i64, scratch_operands = 0 : i64, tpu.core_type = #tpu.core_type<tc>, window_params = [{transform_indices = @transform_0, window_bounds = array<i64: 1, 16, 256>}, {transform_indices = @transform_1, window_bounds = array<i64: 1, 16, 256>}, {pipeline_mode = #tpu.pipeline_mode<synchronous>, transform_indices = @transform_2, window_bounds = array<i64: 16, 16>}, {pipeline_mode = #tpu.pipeline_mode<synchronous>, transform_indices = @transform_3, window_bounds = array<i64: 16, 16>}, {transform_indices = @transform_4, window_bounds = array<i64: 1, 16, 256>}]} {
    %c0 = arith.constant 0 : index
    %c0_0 = arith.constant 0 : index
    %c0_1 = arith.constant 0 : index
    %0 = vector.load %arg2[%c0, %c0_0, %c0_1] : memref<1x16x256xf32, #tpu.memory_space<vmem>>, vector<1x16x256xf32>
    %1 = vector.shape_cast %0 : vector<1x16x256xf32> to vector<16x256xf32>
    %c0_2 = arith.constant 0 : index
    %c0_3 = arith.constant 0 : index
    %c0_4 = arith.constant 0 : index
    %2 = vector.load %arg3[%c0_2, %c0_3, %c0_4] : memref<1x16x256xf32, #tpu.memory_space<vmem>>, vector<1x16x256xf32>
    %3 = vector.shape_cast %2 : vector<1x16x256xf32> to vector<16x256xf32>
    %c0_5 = arith.constant 0 : index
    %c0_6 = arith.constant 0 : index
    %4 = vector.load %arg4[%c0_5, %c0_6] : memref<16x16xf32, #tpu.memory_space<vmem>>, vector<16x16xf32>
    %cst = arith.constant dense<0.000000e+00> : vector<16x256xf32>
    %5 = tpu.matmul %4, %1, %cst {dimension_numbers = #tpu.dot_dimension_numbers<[1], [0], [0], [1], [0, 0, 1, 1], [], []>} : vector<16x16xf32>, vector<16x256xf32>, vector<16x256xf32> -> vector<16x256xf32>
    %cst_7 = arith.constant dense<0.000000e+00> : vector<256x256xf32>
    %6 = tpu.matmul %3, %5, %cst_7 {dimension_numbers = #tpu.dot_dimension_numbers<[0], [0], [1], [1], [0, 1, 1, 1], [], []>} : vector<16x256xf32>, vector<16x256xf32>, vector<256x256xf32> -> vector<256x256xf32>
    %7 = arith.negf %6 : vector<256x256xf32>
    %8 = math.exp %7 : vector<256x256xf32>
    %cst_8 = arith.constant 1.000000e+00 : f32
    %9 = vector.broadcast %cst_8 : f32 to vector<256x256xf32>
    %10 = arith.addf %9, %8 : vector<256x256xf32>
    %11 = arith.divf %9, %10 : vector<256x256xf32>
    %c0_9 = arith.constant 0 : index
    %c0_10 = arith.constant 0 : index
    %12 = vector.load %arg5[%c0_9, %c0_10] : memref<16x16xf32, #tpu.memory_space<vmem>>, vector<16x16xf32>
    %cst_11 = arith.constant dense<0.000000e+00> : vector<16x256xf32>
    %13 = tpu.matmul %12, %3, %cst_11 {dimension_numbers = #tpu.dot_dimension_numbers<[1], [0], [0], [1], [0, 0, 1, 1], [], []>} : vector<16x16xf32>, vector<16x256xf32>, vector<16x256xf32> -> vector<16x256xf32>
    %cst_12 = arith.constant dense<0.000000e+00> : vector<16x256xf32>
    %14 = tpu.matmul %13, %11, %cst_12 {dimension_numbers = #tpu.dot_dimension_numbers<[1], [0], [0], [1], [0, 0, 1, 1], [], []>} : vector<16x256xf32>, vector<256x256xf32>, vector<16x256xf32> -> vector<16x256xf32>
    %15 = arith.addf %14, %1 : vector<16x256xf32>
    %16 = vector.shape_cast %15 : vector<16x256xf32> to vector<1x16x256xf32>
    %c0_13 = arith.constant 0 : index
    %c0_14 = arith.constant 0 : index
    %c0_15 = arith.constant 0 : index
    %17 = vector.load %arg6[%c0_13, %c0_14, %c0_15] : memref<1x16x256xf32, #tpu.memory_space<vmem>>, vector<1x16x256xf32>
    tpu.vector_store %arg6[%c0_13, %c0_14, %c0_15], %16 {strides = array<i32>} : memref<1x16x256xf32, #tpu.memory_space<vmem>>, vector<1x16x256xf32>,
    return
  }
  func.func @transform_0(%arg0: i32, %arg1: i32) -> (i32, i32, i32) {
    %c0_i32 = arith.constant 0 : i32
    %c0_i32_0 = arith.constant 0 : i32
    return %arg0, %c0_i32, %arg1 : i32, i32, i32
  }
  func.func @transform_1(%arg0: i32, %arg1: i32) -> (i32, i32, i32) {
    %c0_i32 = arith.constant 0 : i32
    %c0_i32_0 = arith.constant 0 : i32
    %c0_i32_1 = arith.constant 0 : i32
    return %arg0, %c0_i32, %c0_i32_0 : i32, i32, i32
  }
  func.func @transform_2(%arg0: i32, %arg1: i32) -> (i32, i32) {
    %c0_i32 = arith.constant 0 : i32
    %c0_i32_0 = arith.constant 0 : i32
    %c0_i32_1 = arith.constant 0 : i32
    return %c0_i32, %c0_i32_0 : i32, i32
  }
  func.func @transform_3(%arg0: i32, %arg1: i32) -> (i32, i32) {
    %c0_i32 = arith.constant 0 : i32
    %c0_i32_0 = arith.constant 0 : i32
    %c0_i32_1 = arith.constant 0 : i32
    return %c0_i32, %c0_i32_0 : i32, i32
  }
  func.func @transform_4(%arg0: i32, %arg1: i32) -> (i32, i32, i32) {
    %c0_i32 = arith.constant 0 : i32
    %c0_i32_0 = arith.constant 0 : i32
    return %arg0, %c0_i32, %arg1 : i32, i32, i32
  }
}

</mosaic_0001>

<bundles_post_ra>
// kernel: self_attn_forward.1
= control target key start
LH: loop header
LB: loop body
LE: loop exit
PB: predicated region body
PF: predicated region fallthrough
CT: control target
= control target key end

     0   :  { %s2661_s15 = smov 0   ;;  %s2663_s16 = smov 0   ;;  %s4691_s0 = inlined_call_operand.vmem [shape: f32[2,16,256], index: 0, kind: input, shape index: {}, may-alias: {0,1}]   ;;  %s4692_s1 = inlined_call_operand.vmem [shape: f32[2,16,256], index: 1, kind: input, shape index: {}, may-alias: {0,1}]   ;;  %s4693_s2 = inlined_call_operand.vmem [shape: f32[16,16], index: 2, kind: input, shape index: {}]   ;;  %s4694_s3 = inlined_call_operand.vmem [shape: f32[16,16], index: 3, kind: input, shape index: {}]   ;;  %s4695_s4 = inlined_call_operand.vmem [shape: f32[2,16,256], index: 4, kind: output, shape index: {}]  }
   0x1   :  { %s2665_s17 = smov 0  }
   0x2 LB: > { %s26_s18 = sadd.s32 1, %s2630_s16  ;;  %p2175_p0 = scmp.ge.s32.totalorder %s2634_s17, 1  ;;  %s2634_s17 = sphi %s2665_s17, %s14_s17   ;;  %s2630_s16 = sphi %s2663_s16, %s5012_s16   ;;  %s2626_s15 = sphi %s2661_s15, %s5011_s15  }
   0x3   : > { %p28_p1 = scmp.ge.s32.totalorder %s26_s18, 2  ;;  %p193_p2 = scmp.lt.s32.totalorder %s2634_s17, 3 }
   0x5   : > { %s5014_s18 = smov (%p28_p1, %s26_s18), 0  ;;  %p194_p3 = pnand %p2175_p0, %p193_p2 }
   0x7   : > { %197 = sbr.rel (%p194_p3) target bundleno = 795 (0x31b), region = 36 }
   0xc   : > { %p233_p4 = scmp.lt.s32.totalorder %s2626_s15, 1  ;;  %v265_v2 = vld [vmem:[%s4693_s2] sm:$0xff]  ;;  %vm267_vm0 = vcmask 130048   ;;  %v266_v9 = vld [vmem:[%s4693_s2 + $0x8] sm:$0xff] }
   0xe   : > { %s5016_s15 = smov (!%p233_p4, %s2626_s15), 1 }
   0xf   : > { %s2679_s19 = sshll.u32 %s5016_s15, 5 }
  0x10   : > { %s246_s22 = scalar_lea.vmem %s4692_s1, %s2679_s19  ;;  %s2689_s25 = scalar_lea.vmem %s4691_s0, %s2679_s19 }
  0x11   : > { %v261_v0 = vld [vmem:[%s246_s22] sm:$0xff]  ;;  %v259_v1 = vld [vmem:[%s2689_s25 + $0x10] sm:$0xff]  ;;  %v260_v3 = vld [vmem:[%s2689_s25 + $0x18] sm:$0xff]  ;;  %s255_s10 = scalar_lea.vmem %s4695_s4, %s2679_s19 }
  0x12   : > { %320 = vxpose.xlu0.b32.start [1/2] (short) %v261_v0, 128  ;;  %288 = vmatpush.msra.mxu0 %v259_v1  ;;  %v257_v4 = vld [vmem:[%s2689_s25] sm:$0xff]  ;;  %v258_v5 = vld [vmem:[%s2689_s25 + $0x8] sm:$0xff]  ;;  %v263_v7 = vld [vmem:[%s246_s22 + $0x10] sm:$0xff] }
  0x13   : > { %311 = vmatpush.msra.mxu1 %v260_v3  ;;  %v262_v6 = vld [vmem:[%s246_s22 + $0x8] sm:$0xff]  ;;  %v264_v8 = vld [vmem:[%s246_s22 + $0x18] sm:$0xff] }
  0x14   : > { %289 = vmatpush.msra.mxu0 %v257_v4  ;;  %352 = vxpose.xlu1.b32.start [1/2] (short) %v262_v6, 128 }
  0x15   : > { %312 = vmatpush.msra.mxu1 %v258_v5  ;;  %2182 = vmatmul.msk.f32.vlgmr.msra.gmra.mxu0 %vm267_vm0, %v265_v2 }
  0x16   : > { %2184 = vmatmul.msk.f32.vlgmr.msra.gmra.mxu1 %vm267_vm0, %v265_v2 }
  0x1a   : > { %321 = vxpose.xlu0.b32.end [2/2] (short) %v263_v7, 128 }
  0x1c   : > { %353 = vxpose.xlu1.b32.end [2/2] (short) %v264_v8, 128 }
  0x1d   : > { %2183 = vmatmul.msk.f32.gmra.mxu0 %vm267_vm0, %v266_v9 }
  0x1e   : > { %2185 = vmatmul.msk.f32.gmra.mxu1 %vm267_vm0, %v266_v9 }
  0x92   : > { %v291_v10 = vpop.f32.mrf.mxu0 }
  0x93   : > { %v314_v11 = vpop.f32.mrf.mxu1 }
  0x9a   : > { %v294_v12 = vpop.f32.mrf.mxu0 }
  0x9b   : > { %v317_v13 = vpop.f32.mrf.mxu1  ;;  %494 = vmatpush.msrb.mxu0 %v294_v12  ;;  %2323 = vmatpush.msra.mxu2 %v294_v12 }
  0x9c   : > { %607 = vmatpush.msrb.mxu1 %v317_v13  ;;  %2325 = vmatpush.msra.mxu3 %v317_v13 }
  0x9d   : > { %495 = vmatpush.msrb.mxu0 %v291_v10  ;;  %2324 = vmatpush.msra.mxu2 %v291_v10 }
  0x9e   : > { %608 = vmatpush.msrb.mxu1 %v314_v11  ;;  %2326 = vmatpush.msra.mxu3 %v314_v11 }
  0x9f   : > { %1944 = vmatpush.msra.mxu0 %v263_v7 }
  0xa0   : > { %1967 = vmatpush.msra.mxu1 %v264_v8 }
  0xa1   : > { %1945 = vmatpush.msra.mxu0 %v261_v0 }
  0xa2   : > { %1968 = vmatpush.msra.mxu1 %v262_v6 }
  0xb6   : > { %v336_v14 = vpop.trf.xlu0 }
  0xb7   : > { %2186 = vmatmul.msk.f32.vlgmr.msrb.gmra.mxu0 %vm267_vm0, %v336_v14  ;;  %2218 = vmatmul.msk.f32.vlgmr.msrb.gmra.mxu1 %vm267_vm0, %v336_v14 }
  0xb8   : > { %v368_v27 = vpop.trf.xlu1 }
  0xbe   : > { %v337_v15 = vpop.trf.xlu0 }
  0xbf   : > { %2187 = vmatmul.msk.f32.gmra.mxu0 %vm267_vm0, %v337_v15  ;;  %2219 = vmatmul.msk.f32.gmra.mxu1 %vm267_vm0, %v337_v15 }
  0xc0   : > { %v369_v29 = vpop.trf.xlu1 }
  0xc6   : > { %v338_v16 = vpop.trf.xlu0 }
  0xc7   : > { %2188 = vmatmul.msk.f32.gmra.mxu0 %vm267_vm0, %v338_v16  ;;  %2220 = vmatmul.msk.f32.gmra.mxu1 %vm267_vm0, %v338_v16 }
  0xc8   : > { %v370_v31 = vpop.trf.xlu1 }
  0xce   : > { %v339_v17 = vpop.trf.xlu0 }
  0xcf   : > { %2189 = vmatmul.msk.f32.gmra.mxu0 %vm267_vm0, %v339_v17  ;;  %2221 = vmatmul.msk.f32.gmra.mxu1 %vm267_vm0, %v339_v17 }
  0xd0   : > { %v371_v33 = vpop.trf.xlu1 }
  0xd6   : > { %v340_v18 = vpop.trf.xlu0 }
  0xd7   : > { %2190 = vmatmul.msk.f32.gmra.mxu0 %vm267_vm0, %v340_v18  ;;  %2222 = vmatmul.msk.f32.gmra.mxu1 %vm267_vm0, %v340_v18 }
  0xd8   : > { %v372_v34 = vpop.trf.xlu1 }
  0xde   : > { %v341_v19 = vpop.trf.xlu0 }
  0xdf   : > { %2191 = vmatmul.msk.f32.gmra.mxu0 %vm267_vm0, %v341_v19  ;;  %2223 = vmatmul.msk.f32.gmra.mxu1 %vm267_vm0, %v341_v19 }
  0xe0   : > { %v373_v36 = vpop.trf.xlu1 }
  0xe6   : > { %v342_v20 = vpop.trf.xlu0 }
  0xe7   : > { %2192 = vmatmul.msk.f32.gmra.mxu0 %vm267_vm0, %v342_v20  ;;  %2224 = vmatmul.msk.f32.gmra.mxu1 %vm267_vm0, %v342_v20 }
  0xe8   : > { %v374_v39 = vpop.trf.xlu1 }
  0xee   : > { %v343_v21 = vpop.trf.xlu0 }
  0xef   : > { %2193 = vmatmul.msk.f32.gmra.mxu0 %vm267_vm0, %v343_v21  ;;  %2225 = vmatmul.msk.f32.gmra.mxu1 %vm267_vm0, %v343_v21 }
  0xf0   : > { %v375_v42 = vpop.trf.xlu1 }
  0xf6   : > { %v344_v22 = vpop.trf.xlu0 }
  0xf7   : > { %2194 = vmatmul.msk.f32.gmra.mxu0 %vm267_vm0, %v344_v22  ;;  %2226 = vmatmul.msk.f32.gmra.mxu1 %vm267_vm0, %v344_v22 }
  0xf8   : > { %v376_v45 = vpop.trf.xlu1 }
  0xfe   : > { %v345_v23 = vpop.trf.xlu0 }
  0xff   : > { %2195 = vmatmul.msk.f32.gmra.mxu0 %vm267_vm0, %v345_v23  ;;  %2227 = vmatmul.msk.f32.gmra.mxu1 %vm267_vm0, %v345_v23 }
 0x100   : > { %v377_v48 = vpop.trf.xlu1 }
 0x106   : > { %v346_v24 = vpop.trf.xlu0 }
 0x107   : > { %2196 = vmatmul.msk.f32.vlgmr.msra.gmra.mxu2 %vm267_vm0, %v346_v24  ;;  %2228 = vmatmul.msk.f32.vlgmr.msra.gmra.mxu3 %vm267_vm0, %v346_v24 }
 0x108   : > { %v378_v52 = vpop.trf.xlu1 }
 0x10e   : > { %v347_v25 = vpop.trf.xlu0 }
 0x10f   : > { %2197 = vmatmul.msk.f32.gmra.mxu2 %vm267_vm0, %v347_v25  ;;  %2229 = vmatmul.msk.f32.gmra.mxu3 %vm267_vm0, %v347_v25 }
 0x110   : > { %v379_v58 = vpop.trf.xlu1 }
 0x116   : > { %v348_v26 = vpop.trf.xlu0 }
 0x117   : > { %2198 = vmatmul.msk.f32.gmra.mxu2 %vm267_vm0, %v348_v26  ;;  %2230 = vmatmul.msk.f32.gmra.mxu3 %vm267_vm0, %v348_v26 }
 0x118   : > { %v380_v10 = vpop.trf.xlu1 }
 0x11e   : > { %v349_v28 = vpop.trf.xlu0 }
 0x11f   : > { %2199 = vmatmul.msk.f32.gmra.mxu2 %vm267_vm0, %v349_v28  ;;  %2231 = vmatmul.msk.f32.gmra.mxu3 %vm267_vm0, %v349_v28 }
 0x126   : > { %v350_v30 = vpop.trf.xlu0 }
 0x127   : > { %2200 = vmatmul.msk.f32.gmra.mxu2 %vm267_vm0, %v350_v30  ;;  %2232 = vmatmul.msk.f32.gmra.mxu3 %vm267_vm0, %v350_v30 }
 0x12e   : > { %v351_v32 = vpop.trf.xlu0 }
 0x12f   : > { %2201 = vmatmul.msk.f32.gmra.mxu2 %vm267_vm0, %v351_v32  ;;  %2233 = vmatmul.msk.f32.gmra.mxu3 %vm267_vm0, %v351_v32 }
 0x134   : > { %v497_v35 = vpop.f32.mrf.mxu0  ;;  %v610_v38 = vpop.f32.mrf.mxu1 }
 0x135   : > { %v2250_v51 = vmul.f32 -1.442695, %v497_v35  ;;  %v2251_v53 = vmul.f32 -1.442695, %v610_v38 }
 0x137   : > { %2202 = vmatmul.msk.f32.gmra.mxu2 %vm267_vm0, %v368_v27  ;;  %2234 = vmatmul.msk.f32.gmra.mxu3 %vm267_vm0, %v368_v27  ;;  %2352 = vpow2.f32 %v2250_v51 }
 0x138   : > { %2354 = vpow2.f32 %v2251_v53 }
 0x13c   : > { %v500_v37 = vpop.f32.mrf.mxu0  ;;  %v613_v41 = vpop.f32.mrf.mxu1 }
 0x13d   : > { %v2252_v54 = vmul.f32 -1.442695, %v500_v37  ;;  %v2353_v57 = vpop.eup %2352  ;;  %v2253_v0 = vmul.f32 -1.442695, %v613_v41 }
 0x13e   : > { %v2355_v59 = vpop.eup %2354  ;;  %v2759_v60 = vadd.f32 1.0, %v2353_v57 }
 0x13f   : > { %2203 = vmatmul.msk.f32.gmra.mxu2 %vm267_vm0, %v369_v29  ;;  %2235 = vmatmul.msk.f32.gmra.mxu3 %vm267_vm0, %v369_v29  ;;  %2356 = vpow2.f32 %v2252_v54  ;;  %v2761_v62 = vadd.f32 1.0, %v2355_v59 }
 0x140   : > { %2358 = vrcp.f32 %v2759_v60  ;;  %v971_v35 = vand.u32 2147483647, %v2759_v60  ;;  %vm967_vm1 = vweird.f32 %v2759_v60 }
 0x141   : > { %4742 = vst [vmem:[#allocation2_spill] sm:$0xff] %v2761_v62 }
 0x142   : > { %vm2830_vm2 = vcmp.eq.f32.partialorder %v971_v35, 8.507059e+37 }
 0x144   : > { %v503_v40 = vpop.f32.mrf.mxu0  ;;  %v616_v44 = vpop.f32.mrf.mxu1 }
 0x145   : > { %v2254_v61 = vmul.f32 -1.442695, %v503_v40  ;;  %v2357_v63 = vpop.eup %2356  ;;  %v2255_v1 = vmul.f32 -1.442695, %v616_v44 }
 0x146   : > { %v2771_v6 = vadd.f32 1.0, %v2357_v63  ;;  %v2775_v11 = vpop.eup %2358 }
 0x147   : > { %2204 = vmatmul.msk.f32.gmra.mxu2 %vm267_vm0, %v370_v31  ;;  %2236 = vmatmul.msk.f32.gmra.mxu3 %vm267_vm0, %v370_v31  ;;  %2360 = vpow2.f32 %v2254_v61  ;;  %v963_v22 = vmul.f32 %v2775_v11, %v2759_v60  ;;  %v381_v31 = vpop.trf.xlu1  ;;  %vm968_vm3 = vweird.f32 %v2775_v11 }
 0x148   : > { %2362 = vrcp.f32 %v2761_v62  ;;  %vm997_vm4 = vweird.f32 %v2771_v6  ;;  %vm2865_vm5 = vmor %vm967_vm1, %vm968_vm3 }
 0x149   : > { %2364 = vpow2.f32 %v2253_v0  ;;  %v964_v32 = vsub.f32 1.0, %v963_v22 }
 0x14a   : > { %2366 = vpow2.f32 %v2255_v1  ;;  %v1001_v1 = vand.u32 2147483647, %v2771_v6 }
 0x14b   : > { %v965_v44 = vmul.f32 %v2775_v11, %v964_v32 }
 0x14c   : > { %v506_v43 = vpop.f32.mrf.mxu0  ;;  %v619_v47 = vpop.f32.mrf.mxu1  ;;  %vm2887_vm7 = vcmp.eq.f32.partialorder %v1001_v1, 8.507059e+37 }
 0x14d   : > { %v2256_v3 = vmul.f32 -1.442695, %v506_v43  ;;  %v2257_v8 = vmul.f32 -1.442695, %v619_v47  ;;  %v2361_v12 = vpop.eup %2360  ;;  %v966_v59 = vadd.f32 %v2775_v11, %v965_v44 }
 0x14e   : > { %v2780_v14 = vpop.eup %2362  ;;  %v2786_v20 = vadd.f32 1.0, %v2361_v12 }
 0x14f   : > { %2205 = vmatmul.msk.f32.gmra.mxu2 %vm267_vm0, %v371_v33  ;;  %2237 = vmatmul.msk.f32.gmra.mxu3 %vm267_vm0, %v371_v33  ;;  %2368 = vpow2.f32 %v2256_v3  ;;  %4743 = vst [vmem:[#allocation3_spill] sm:$0xff] %v2780_v14  ;;  %v2365_v15 = vpop.eup %2364 }
 0x150   : > { %2370 = vrcp.f32 %v2771_v6  ;;  %v2367_v19 = vpop.eup %2366  ;;  %v2792_v25 = vadd.f32 1.0, %v2365_v15  ;;  %vm1027_vm8 = vweird.f32 %v2786_v20 }
 0x151   : > { %2372 = vpow2.f32 %v2257_v8  ;;  %v2796_v28 = vadd.f32 1.0, %v2367_v19  ;;  %v382_v8 = vpop.trf.xlu1 }
 0x152   : > { %4744 = vst [vmem:[#allocation4_spill] sm:$0xff] %v2792_v25 }
 0x153   : > { %4745 = vst [vmem:[#allocation5_spill] sm:$0xff] %v2796_v28 }
 0x154   : > { %v509_v46 = vpop.f32.mrf.mxu0  ;;  %v622_v50 = vpop.f32.mrf.mxu1 }
 0x155   : > { %v2258_v9 = vmul.f32 -1.442695, %v509_v46  ;;  %v2259_v13 = vmul.f32 -1.442695, %v622_v50  ;;  %v2369_v23 = vpop.eup %2368  ;;  %v1003_v50 = vand.u32 2147483648, %v2771_v6 }
 0x156   : > { %v2790_v24 = vpop.eup %2370  ;;  %v2799_v30 = vadd.f32 1.0, %v2369_v23  ;;  %v970_v23 = vsel %vm2865_vm5, %v2775_v11, %v966_v59 }
 0x157   : > { %2206 = vmatmul.msk.f32.gmra.mxu2 %vm267_vm0, %v372_v34  ;;  %2238 = vmatmul.msk.f32.gmra.mxu3 %vm267_vm0, %v372_v34  ;;  %2374 = vpow2.f32 %v2258_v9  ;;  %v2373_v27 = vpop.eup %2372  ;;  %v993_v41 = vmul.f32 %v2790_v24, %v2771_v6  ;;  %v2854_v9 = vor.u32 1.1754944e-38, %v1003_v50  ;;  %vm998_vm6 = vweird.f32 %v2790_v24 }
 0x158   : > { %2376 = vpow2.f32 %v2259_v13  ;;  %v2804_v34 = vadd.f32 1.0, %v2373_v27  ;;  %vm2923_vm10 = vmor %vm997_vm4, %vm998_vm6  ;;  %v1061_v1 = vand.u32 2147483647, %v2799_v30  ;;  %vm1057_vm12 = vweird.f32 %v2799_v30 }
 0x159   : > { %v994_v53 = vsub.f32 1.0, %v993_v41  ;;  %v1031_v41 = vand.u32 2147483647, %v2786_v20 }
 0x15a   : > { %4746 = vst [vmem:[#allocation6_spill] sm:$0xff] %v2804_v34  ;;  %vm2966_vm13 = vcmp.eq.f32.partialorder %v1061_v1, 8.507059e+37 }
 0x15b   : > { %v995_v19 = vmul.f32 %v2790_v24, %v994_v53  ;;  %vm2932_vm11 = vcmp.eq.f32.partialorder %v1031_v41, 8.507059e+37 }
 0x15c   : > { %v512_v49 = vpop.f32.mrf.mxu0  ;;  %v2757_v56 = vpop.f32.mrf.mxu1 }
 0x15d   : > { %v2260_v16 = vmul.f32 -1.442695, %v512_v49  ;;  %v2375_v29 = vpop.eup %2374  ;;  %v2261_v46 = vmul.f32 -1.442695, %v2757_v56 }
 0x15e   : > { %v2377_v37 = vpop.eup %2376  ;;  %v2809_v38 = vadd.f32 1.0, %v2375_v29 }
 0x15f   : > { %2207 = vmatmul.msk.f32.gmra.mxu2 %vm267_vm0, %v373_v36  ;;  %2239 = vmatmul.msk.f32.gmra.mxu3 %vm267_vm0, %v373_v36  ;;  %2378 = vpow2.f32 %v2260_v16  ;;  %v973_v36 = vand.u32 2147483648, %v2759_v60 }
 0x160   : > { %2380 = vrcp.f32 %v2786_v20 }
 0x161   : > { %2382 = vrcp.f32 %v2792_v25  ;;  %v974_v51 = vor.u32 1.1754944e-38, %v973_v36 }
 0x162   : > { %2384 = vrcp.f32 %v2796_v28 }
 0x163   : > { %2386 = vrcp.f32 %v2799_v30 }
 0x164   : > { %v515_v55 = vpop.f32.mrf.mxu0  ;;  %v2773_v7 = vpop.f32.mrf.mxu1 }
 0x165   : > { %v2262_v33 = vmul.f32 -1.442695, %v515_v55  ;;  %v2263_v60 = vmul.f32 -1.442695, %v2773_v7 }
 0x167   : > { %2208 = vmatmul.msk.f32.gmra.mxu2 %vm267_vm0, %v374_v39  ;;  %2240 = vmatmul.msk.f32.gmra.mxu3 %vm267_vm0, %v374_v39  ;;  %2388 = vpow2.f32 %v2262_v33 }
 0x168   : > { %2390 = vrcp.f32 %v2804_v34 }
 0x169   : > { %2392 = vrcp.f32 %v2809_v38 }
 0x16c   : > { %v518_v2 = vpop.f32.mrf.mxu0  ;;  %v2794_v26 = vpop.f32.mrf.mxu1 }
 0x16d   : > { %v2264_v43 = vmul.f32 -1.442695, %v518_v2  ;;  %v2265_v44 = vmul.f32 -1.442695, %v2794_v26 }
 0x16f   : > { %2209 = vmatmul.msk.f32.gmra.mxu2 %vm267_vm0, %v375_v42  ;;  %2241 = vmatmul.msk.f32.gmra.mxu3 %vm267_vm0, %v375_v42  ;;  %v978_v42 = vmul.f32 %v2780_v14, %v2761_v62  ;;  %2394 = vpow2.f32 %v2264_v43 }
 0x170   : > { %2396 = vpow2.f32 %v2261_v46 }
 0x171   : > { %v979_v55 = vsub.f32 1.0, %v978_v42  ;;  %v996_v42 = vadd.f32 %v2790_v24, %v995_v19 }
 0x173   : > { %v1000_v6 = vsel %vm2923_vm10, %v2790_v24, %v996_v42 }
 0x174   : > { %v521_v21 = vpop.f32.mrf.mxu0 }
 0x177   : > { %2210 = vmatmul.msk.f32.gmra.mxu2 %vm267_vm0, %v376_v45  ;;  %2242 = vmatmul.msk.f32.gmra.mxu3 %vm267_vm0, %v376_v45  ;;  %v2379_v45 = vpop.eup %2378 }
 0x178   : > { %v2823_v47 = vpop.eup %2380  ;;  %v2836_v57 = vadd.f32 1.0, %v2379_v45  ;;  %v2908_v45 = vsel %vm2830_vm2, %v974_v51, %v970_v23 }
 0x179   : > { %v2834_v56 = vpop.eup %2382  ;;  %v1023_v0 = vmul.f32 %v2823_v47, %v2786_v20  ;;  %4759 = vst [vmem:[#allocation13_spill] sm:$0xff] %v2908_v45  ;;  %vm1028_vm9 = vweird.f32 %v2823_v47 }
 0x17a   : > { %4750 = vst [vmem:[#allocation8_spill] sm:$0xff] %v2834_v56  ;;  %v2844_v61 = vpop.eup %2384  ;;  %v2893_v11 = vmul.f32 %v2834_v56, %v2792_v25  ;;  %vm2974_vm14 = vmor %vm1027_vm8, %vm1028_vm9 }
 0x17b   : > { %4751 = vst [vmem:[#allocation9_spill] sm:$0xff] %v2844_v61  ;;  %v2850_v2 = vpop.eup %2386  ;;  %v1024_v29 = vsub.f32 1.0, %v1023_v0 }
 0x17c   : > { %v524_v49 = vpop.f32.mrf.mxu0  ;;  %v2389_v12 = vpop.eup %2388  ;;  %v1053_v35 = vmul.f32 %v2850_v2, %v2799_v30  ;;  %v1009_v54 = vsub.f32 1.0, %v2893_v11  ;;  %v2957_v11 = vsel %vm2887_vm7, %v2854_v9, %v1000_v6  ;;  %vm1058_vm15 = vweird.f32 %v2850_v2 }
 0x17d   : > { %v2268_v63 = vmul.f32 -1.442695, %v524_v49  ;;  %v2872_v22 = vpop.eup %2390  ;;  %v2883_v33 = vadd.f32 1.0, %v2389_v12  ;;  %v1025_v49 = vmul.f32 %v2823_v47, %v1024_v29  ;;  %v1038_v29 = vmul.f32 %v2844_v61, %v2796_v28  ;;  %4764 = vst [vmem:[#allocation14_spill] sm:$0xff] %v2957_v11  ;;  %vm3012_vm1 = vmor %vm1057_vm12, %vm1058_vm15 }
 0x17e   : > { %4755 = vst [vmem:[#allocation11_spill] sm:$0xff] %v2872_v22  ;;  %v2879_v27 = vpop.eup %2392  ;;  %v1054_v53 = vsub.f32 1.0, %v1053_v35  ;;  %v1123_v9 = vand.u32 2147483648, %v2836_v57 }
 0x17f   : > { %2211 = vmatmul.msk.f32.gmra.mxu2 %vm267_vm0, %v377_v48  ;;  %2243 = vmatmul.msk.f32.gmra.mxu3 %vm267_vm0, %v377_v48  ;;  %v2826_v48 = vadd.f32 1.0, %v2377_v37  ;;  %v2395_v32 = vpop.eup %2394  ;;  %v1083_v35 = vmul.f32 %v2879_v27, %v2809_v38 }
 0x180   : > { %v2895_v7 = vpop.eup %2396  ;;  %v2910_v46 = vadd.f32 1.0, %v2395_v32  ;;  %v1055_v24 = vmul.f32 %v2850_v2, %v1054_v53  ;;  %v2985_v53 = vmul.f32 %v2834_v56, %v1009_v54  ;;  %v1093_v54 = vand.u32 2147483648, %v2809_v38 }
 0x181   : > { %4747 = vst [vmem:[#allocation7_spill] sm:$0xff] %v2826_v48  ;;  %2398 = vrcp.f32 %v2826_v48  ;;  %v1084_v6 = vsub.f32 1.0, %v1083_v35 }
 0x182   : > { %4769 = vst [vmem:[#allocation15_spill] sm:$0xff] %v2985_v53 }
 0x187   : > { %2212 = vmatmul.msk.f32.gmra.mxu2 %vm267_vm0, %v378_v52  ;;  %2244 = vmatmul.msk.f32.gmra.mxu3 %vm267_vm0, %v378_v52  ;;  %v2266_v52 = vmul.f32 -1.442695, %v521_v21  ;;  %v2870_v21 = vmul.f32 %v2780_v14, %v979_v55  ;;  %v2900_v43 = vpop.eup %2398 }
 0x188   : > { %4758 = vst [vmem:[#allocation12_spill] sm:$0xff] %v2900_v43 }
 0x189   : > { %2400 = vpow2.f32 %v2266_v52  ;;  %4754 = vst [vmem:[#allocation10_spill] sm:$0xff] %v2870_v21 }
 0x18a   : > { %v2766_v4 = vpop.f32.mrf.mxu2  ;;  %v2768_v5 = vpop.f32.mrf.mxu3  ;;  %2402 = vrcp.f32 %v2836_v57 }
 0x18b   : > { %v2270_v3 = vmul.f32 -1.442695, %v2766_v4  ;;  %2404 = vpow2.f32 %v2268_v63  ;;  %v383_v4 = vpop.trf.xlu1 }
 0x18d   : > { %2406 = vpow2.f32 %v2270_v3  ;;  %v3019_v3 = vmul.f32 %v2872_v22, %v2804_v34 }
 0x18f   : > { %2213 = vmatmul.msk.f32.gmra.mxu2 %vm267_vm0, %v379_v58  ;;  %2245 = vmatmul.msk.f32.gmra.mxu3 %vm267_vm0, %v379_v58  ;;  %v2838_v58 = vpop.f32.mrf.mxu1  ;;  %4773 = vst [vmem:[#allocation17_spill] sm:$0xff] %v3019_v3 }
 0x190   : > { %v2267_v59 = vmul.f32 -1.442695, %v2838_v58  ;;  %v1063_v58 = vand.u32 2147483648, %v2799_v30 }
 0x192   : > { %v2782_v17 = vpop.f32.mrf.mxu2  ;;  %v2784_v18 = vpop.f32.mrf.mxu3 }
 0x193   : > { %v2272_v13 = vmul.f32 -1.442695, %v2782_v17 }
 0x195   : > { %2408 = vpow2.f32 %v2272_v13 }
 0x197   : > { %2214 = vmatmul.msk.f32.gmra.mxu2 %vm267_vm0, %v380_v10  ;;  %2246 = vmatmul.msk.f32.gmra.mxu3 %vm267_vm0, %v380_v10  ;;  %v637_v52 = vpop.f32.mrf.mxu1 }
 0x198   : > { %v2269_v19 = vmul.f32 -1.442695, %v637_v52 }
 0x19a   : > { %v2811_v39 = vpop.f32.mrf.mxu2  ;;  %v2813_v40 = vpop.f32.mrf.mxu3 }
 0x19b   : > { %v2274_v37 = vmul.f32 -1.442695, %v2811_v39  ;;  %v2401_v39 = vpop.eup %2400 }
 0x19c   : > { %v2915_v26 = vpop.eup %2402  ;;  %v2939_v12 = vadd.f32 1.0, %v2401_v39 }
 0x19d   : > { %v2405_v55 = vpop.eup %2404 }
 0x19f   : > { %2215 = vmatmul.msk.f32.gmra.mxu2 %vm267_vm0, %v381_v31  ;;  %2247 = vmatmul.msk.f32.gmra.mxu3 %vm267_vm0, %v381_v31  ;;  %v1033_v31 = vand.u32 2147483648, %v2786_v20  ;;  %v1056_v20 = vadd.f32 %v2850_v2, %v1055_v24  ;;  %v3024_v24 = vadd.f32 1.0, %v2895_v7 }
 0x1a1   : > { %v2913_v50 = vor.u32 1.1754944e-38, %v1033_v31  ;;  %v1060_v30 = vsel %vm3012_vm1, %v2850_v2, %v1056_v20 }
 0x1a2   : > { %v536_v15 = vpop.f32.mrf.mxu2  ;;  %v2858_v16 = vpop.f32.mrf.mxu3 }
 0x1a3   : > { %v2276_v17 = vmul.f32 -1.442695, %v536_v15 }
 0x1a5   : > { %2410 = vpow2.f32 %v2276_v17  ;;  %v1026_v17 = vadd.f32 %v2823_v47, %v1025_v49 }
 0x1a6   : > { %2412 = vpow2.f32 %v2263_v60  ;;  %v2945_v60 = vadd.f32 1.0, %v2405_v55  ;;  %v1039_v55 = vsub.f32 1.0, %v1038_v29  ;;  %v1113_v29 = vmul.f32 %v2915_v26, %v2836_v57 }
 0x1a7   : > { %2216 = vmatmul.msk.f32.gmra.mxu2 %vm267_vm0, %v382_v8  ;;  %2248 = vmatmul.msk.f32.gmra.mxu3 %vm267_vm0, %v382_v8  ;;  %2414 = vrcp.f32 %v2883_v33  ;;  %v2407_v8 = vpop.eup %2406  ;;  %v1030_v52 = vsel %vm2974_vm14, %v2823_v47, %v1026_v17 }
 0x1a8   : > { %2416 = vpow2.f32 %v2274_v37  ;;  %v2409_v15 = vpop.eup %2408  ;;  %v2950_v32 = vadd.f32 1.0, %v2407_v8  ;;  %v3044_v2 = vmul.f32 %v2844_v61, %v1039_v55  ;;  %v1114_v36 = vsub.f32 1.0, %v1113_v29 }
 0x1a9   : > { %2418 = vpow2.f32 %v2265_v44  ;;  %v2962_v41 = vadd.f32 1.0, %v2409_v15  ;;  %v1064_v44 = vor.u32 1.1754944e-38, %v1063_v58  ;;  %v3003_v15 = vsel %vm2932_vm11, %v2913_v50, %v1030_v52 }
 0x1aa   : > { %v539_v63 = vpop.f32.mrf.mxu2  ;;  %v2929_v0 = vpop.f32.mrf.mxu3  ;;  %2420 = vrcp.f32 %v2910_v46  ;;  %4770 = vst [vmem:[#allocation16_spill] sm:$0xff] %v3003_v15  ;;  %v3034_v52 = vor.u32 1.1754944e-38, %v1093_v54  ;;  %v3096_v62 = vmul.f32 %v2915_v26, %v1114_v36  ;;  %vm1267_vm14 = vweird.f32 %v2950_v32 }
 0x1ab   : > { %v2278_v13 = vmul.f32 -1.442695, %v539_v63  ;;  %v2411_v23 = vpop.eup %2410  ;;  %4775 = vst [vmem:[#allocation19_spill] sm:$0xff] %v3044_v2  ;;  %v3052_v54 = vsel %vm2966_vm13, %v1064_v44, %v1060_v30  ;;  %v3070_v44 = vor.u32 1.1754944e-38, %v1123_v9  ;;  %v2273_v2 = vmul.f32 -1.442695, %v2784_v18 }
 0x1ac   : > { %v2413_v31 = vpop.eup %2412  ;;  %v2979_v49 = vadd.f32 1.0, %v2411_v23  ;;  %4774 = vst [vmem:[#allocation18_spill] sm:$0xff] %v3034_v52  ;;  %v2275_v18 = vmul.f32 -1.442695, %v2813_v40  ;;  %v2277_v40 = vmul.f32 -1.442695, %v2858_v16  ;;  %vm1297_vm7 = vweird.f32 %v2962_v41 }
 0x1ad   : > { %2422 = vpow2.f32 %v2278_v13  ;;  %v2959_v37 = vpop.eup %2414  ;;  %v3038_v7 = vadd.f32 1.0, %v2413_v31  ;;  %4776 = vst [vmem:[#allocation20_spill] sm:$0xff] %v3052_v54 }
 0x1ae   : > { %2424 = vpow2.f32 %v2267_v59  ;;  %v2417_v39 = vpop.eup %2416  ;;  %4779 = vst [vmem:[#allocation23_spill] sm:$0xff] %v3070_v44  ;;  %vm1357_vm10 = vweird.f32 %v2979_v49 }
 0x1af   : > { %2426 = vrcp.f32 %v2939_v12  ;;  %2217 = vmatmul.msk.f32.gmra.mxu2 %vm267_vm0, %v383_v4  ;;  %2249 = vmatmul.msk.f32.gmra.mxu3 %vm267_vm0, %v383_v4  ;;  %v2419_v51 = vpop.eup %2418  ;;  %v2998_v13 = vadd.f32 1.0, %v2417_v39  ;;  %v1085_v39 = vmul.f32 %v2879_v27, %v1084_v6 }
 0x1b0   : > { %2428 = vpow2.f32 %v2269_v19  ;;  %v2990_v59 = vpop.eup %2420  ;;  %v3058_v10 = vadd.f32 1.0, %v2419_v51  ;;  %v3077_v51 = vmul.f32 %v2900_v43, %v2826_v48  ;;  %v2279_v48 = vmul.f32 -1.442695, %v2929_v0 }
 0x1b1   : > { %2430 = vrcp.f32 %v2945_v60  ;;  %v1173_v55 = vmul.f32 %v2990_v59, %v2910_v46  ;;  %v3073_v30 = vadd.f32 %v2879_v27, %v1085_v39  ;;  %vm1327_vm2 = vweird.f32 %v2998_v13 }
 0x1b2   : > { %2432 = vrcp.f32 %v2950_v32  ;;  %v542_v63 = vpop.f32.mrf.mxu2  ;;  %v2993_v1 = vpop.f32.mrf.mxu3 }
 0x1b3   : > { %v2423_v8 = vpop.eup %2422  ;;  %2434 = vrcp.f32 %v2962_v41  ;;  %v2280_v58 = vmul.f32 -1.442695, %v542_v63  ;;  %v1174_v6 = vsub.f32 1.0, %v1173_v55 }
 0x1b4   : > { %v2425_v19 = vpop.eup %2424  ;;  %2436 = vrcp.f32 %v2979_v49  ;;  %v3006_v4 = vadd.f32 1.0, %v2423_v8  ;;  %v1143_v8 = vmul.f32 %v2959_v37, %v2883_v33 }
 0x1b5   : > { %v3021_v50 = vpop.eup %2426  ;;  %2438 = vpow2.f32 %v2280_v58  ;;  %v2271_v58 = vmul.f32 -1.442695, %v2768_v5  ;;  %v3122_v34 = vmul.f32 %v2990_v59, %v1174_v6 }
 0x1b6   : > { %v2429_v35 = vpop.eup %2428  ;;  %2440 = vrcp.f32 %v3006_v4  ;;  %v1144_v29 = vsub.f32 1.0, %v1143_v8  ;;  %v1203_v39 = vmul.f32 %v3021_v50, %v2939_v12  ;;  %vm1387_vm9 = vweird.f32 %v3006_v4 }
 0x1b7   : > { %v3036_v63 = vpop.eup %2430  ;;  %2442 = vrcp.f32 %v2998_v13  ;;  %v3098_v53 = vadd.f32 1.0, %v2429_v35  ;;  %v2281_v35 = vmul.f32 -1.442695, %v2993_v1 }
 0x1b8   : > { %v3046_v20 = vpop.eup %2432  ;;  %2444 = vrcp.f32 %v3024_v24  ;;  %v1233_v42 = vmul.f32 %v3036_v63, %v2945_v60  ;;  %v3111_v36 = vmul.f32 %v2959_v37, %v1144_v29  ;;  %v1204_v14 = vsub.f32 1.0, %v1203_v39 }
 0x1b9   : > { %v3055_v17 = vpop.eup %2434  ;;  %2446 = vrcp.f32 %v3038_v7  ;;  %vm1268_vm8 = vweird.f32 %v3046_v20  ;;  %vm1238_vm15 = vweird.f32 %v3036_v63 }
 0x1ba   : > { %v3062_v23 = vpop.eup %2436  ;;  %v3064_v5 = vpop.f32.mrf.mxu2  ;;  %2448 = vpow2.f32 %v2271_v58  ;;  %v1234_v58 = vsub.f32 1.0, %v1233_v42  ;;  %v1293_v55 = vmul.f32 %v3055_v17, %v2962_v41  ;;  %v3136_v0 = vmul.f32 %v3021_v50, %v1204_v14 }
 0x1bb   : > { %4777 = vst [vmem:[#allocation21_spill] sm:$0xff] %v3064_v5  ;;  %v3066_v47 = vpop.f32.mrf.mxu3  ;;  %v2439_v31 = vpop.eup %2438  ;;  %2450 = vrcp.f32 %v3058_v10  ;;  %v1353_v61 = vmul.f32 %v3062_v23, %v2979_v49  ;;  %vm1298_vm3 = vweird.f32 %v3055_v17  ;;  %vm1358_vm11 = vweird.f32 %v3062_v23 }
 0x1bc   : > { %4778 = vst [vmem:[#allocation22_spill] sm:$0xff] %v3066_v47  ;;  %v3082_v21 = vpop.eup %2440  ;;  %v3084_v47 = vadd.f32 1.0, %v2425_v19  ;;  %v3086_v9 = vadd.f32 1.0, %v2439_v31  ;;  %v1263_v19 = vmul.f32 %v3046_v20, %v2950_v32  ;;  %v1235_v11 = vmul.f32 %v3036_v63, %v1234_v58 }
 0x1bd   : > { %v3090_v56 = vpop.eup %2442  ;;  %v1383_v8 = vmul.f32 %v3082_v21, %v3006_v4  ;;  %v1294_v6 = vsub.f32 1.0, %v1293_v55  ;;  %vm1388_vm4 = vweird.f32 %v3082_v21 }
 0x1be   : > { %2452 = vrcp.f32 %v3086_v9  ;;  %v3103_v31 = vpop.eup %2444  ;;  %v1323_v42 = vmul.f32 %v3090_v56, %v2998_v13  ;;  %v1264_v39 = vsub.f32 1.0, %v1263_v19  ;;  %v3149_v55 = vadd.f32 %v3036_v63, %v1235_v11  ;;  %vm3178_vm13 = vmor %vm1387_vm9, %vm1388_vm4 }
 0x1bf   : > { %2454 = vrcp.f32 %v3084_v47  ;;  %v3117_v25 = vpop.eup %2446  ;;  %v1384_v28 = vsub.f32 1.0, %v1383_v8  ;;  %v1354_v8 = vsub.f32 1.0, %v1353_v61  ;;  %vm1328_vm5 = vweird.f32 %v3090_v56 }
 0x1c0   : > { %v2449_v29 = vpop.eup %2448  ;;  %2456 = vrcp.f32 %v3098_v53  ;;  %v1324_v54 = vsub.f32 1.0, %v1323_v42  ;;  %v3146_v16 = vmul.f32 %v3046_v20, %v1264_v39  ;;  %v1295_v42 = vmul.f32 %v3055_v17, %v1294_v6 }
 0x1c1   : > { %v3131_v15 = vpop.eup %2450  ;;  %2458 = vpow2.f32 %v2273_v2  ;;  %v1385_v58 = vmul.f32 %v3082_v21, %v1384_v28  ;;  %v1421_v39 = vand.u32 2147483647, %v3086_v9  ;;  %vm1417_vm12 = vweird.f32 %v3086_v9 }
 0x1c2   : > { %v3126_v1 = vpop.f32.mrf.mxu2  ;;  %2460 = vpow2.f32 %v2281_v35  ;;  %v1355_v35 = vmul.f32 %v3062_v23, %v1354_v8  ;;  %v1391_v61 = vand.u32 2147483647, %v3006_v4  ;;  %vm1237_vm9 = vweird.f32 %v2945_v60 }
 0x1c3   : > { %4780 = vst [vmem:[#allocation24_spill] sm:$0xff] %v3126_v1  ;;  %v3128_v45 = vpop.f32.mrf.mxu3  ;;  %v3138_v1 = vadd.f32 1.0, %v2449_v29  ;;  %2462 = vpow2.f32 %v2275_v18  ;;  %v1325_v18 = vmul.f32 %v3090_v56, %v1324_v54  ;;  %v1393_v54 = vand.u32 2147483648, %v3006_v4 }
 0x1c4   : > { %4781 = vst [vmem:[#allocation25_spill] sm:$0xff] %v3128_v45  ;;  %v2453_v5 = vpop.eup %2452  ;;  %2464 = vpow2.f32 %v2279_v48  ;;  %v1423_v48 = vand.u32 2147483648, %v3086_v9  ;;  %vm1422_vm4 = vcmp.eq.f32.partialorder %v1421_v39, 8.507059e+37 }
 0x1c5   : > { %v1413_v19 = vmul.f32 %v2453_v5, %v3086_v9  ;;  %v3142_v2 = vpop.eup %2454  ;;  %2466 = vpow2.f32 %v2277_v40  ;;  %vm1418_vm6 = vweird.f32 %v2453_v5  ;;  %v1386_v40 = vadd.f32 %v3082_v21, %v1385_v58 }
 0x1c6   : > { %v3155_v28 = vpop.eup %2456  ;;  %vm1419_vm1 = vmor %vm1417_vm12, %vm1418_vm6  ;;  %v1361_v9 = vand.u32 2147483647, %v2979_v49  ;;  %v1326_v52 = vadd.f32 %v3090_v56, %v1325_v18  ;;  %vm1208_vm6 = vweird.f32 %v3021_v50  ;;  %v1394_v44 = vor.u32 1.1754944e-38, %v1393_v54 }
 0x1c7   : > { %v1414_v14 = vsub.f32 1.0, %v1413_v19  ;;  %v3161_v11 = vpop.eup %2458  ;;  %vm3201_vm12 = vmor %vm1357_vm10, %vm1358_vm11  ;;  %vm1178_vm10 = vweird.f32 %v2990_v59 }
 0x1c8   : > { %v2461_v8 = vpop.eup %2460  ;;  %vm3222_vm11 = vmor %vm1327_vm2, %vm1328_vm5  ;;  %vm1177_vm2 = vweird.f32 %v2910_v46  ;;  %vm1148_vm5 = vweird.f32 %v2959_v37 }
 0x1c9   : > { %v1415_v29 = vmul.f32 %v2453_v5, %v1414_v14  ;;  %v2463_v14 = vpop.eup %2462  ;;  %v3190_v3 = vadd.f32 1.0, %v2461_v8 }
 0x1ca   : > { %v3167_v6 = vpop.f32.mrf.mxu2  ;;  %v2465_v45 = vpop.eup %2464 }
 0x1cb   : > { %4782 = vst [vmem:[#allocation26_spill] sm:$0xff] %v3167_v6  ;;  %v3169_v19 = vpop.f32.mrf.mxu3  ;;  %v1416_v43 = vadd.f32 %v2453_v5, %v1415_v29  ;;  %v1424_v29 = vor.u32 1.1754944e-38, %v1423_v48  ;;  %v1363_v6 = vand.u32 2147483648, %v2979_v49  ;;  %v2467_v22 = vpop.eup %2466  ;;  %v3207_v39 = vadd.f32 1.0, %v2465_v45  ;;  %v1922_v49 = vld [vmem:[%s4694_s3] sm:$0xff] }
 0x1cc   : > { %4783 = vst [vmem:[#allocation27_spill] sm:$0xff] %v3169_v19  ;;  %v1356_v19 = vadd.f32 %v3062_v23, %v1355_v35  ;;  %v1390_v35 = vsel %vm3178_vm13, %v3082_v21, %v1386_v40  ;;  %vm1392_vm13 = vcmp.eq.f32.partialorder %v1391_v61, 8.507059e+37  ;;  %v1296_v40 = vadd.f32 %v3055_v17, %v1295_v42  ;;  %2314 = vmatmul.msk.f32.vlgmr.msra.gmra.mxu0 %vm267_vm0, %v1922_v49 }
 0x1cd   : > { %v1420_v4 = vsel %vm1419_vm1, %v2453_v5, %v1416_v43  ;;  %v1331_v43 = vand.u32 2147483647, %v2998_v13  ;;  %v1333_v5 = vand.u32 2147483648, %v2998_v13  ;;  %vm1207_vm1 = vweird.f32 %v2939_v12  ;;  %2316 = vmatmul.msk.f32.vlgmr.msra.gmra.mxu1 %vm267_vm0, %v1922_v49 }
 0x1ce   : > { %v1425_v48 = vsel %vm1422_vm4, %v1424_v29, %v1420_v4  ;;  %v1360_v21 = vsel %vm3201_vm12, %v3062_v23, %v1356_v19  ;;  %v1395_v8 = vsel %vm1392_vm13, %v1394_v44, %v1390_v35  ;;  %v1364_v54 = vor.u32 1.1754944e-38, %v1363_v6  ;;  %vm3249_vm12 = vmor %vm1297_vm7, %vm1298_vm3 }
 0x1cf   : > { %1976 = vmatpush.msrb.mxu0 %v1425_v48  ;;  %v1303_v23 = vand.u32 2147483648, %v2962_v41  ;;  %v1266_v61 = vadd.f32 %v3046_v20, %v3146_v16  ;;  %v3231_v42 = vadd.f32 1.0, %v2467_v22  ;;  %2468 = vrcp.f32 %v3190_v3  ;;  %vm3269_vm3 = vmor %vm1267_vm14, %vm1268_vm8 }
 0x1d0   : > { %vm1362_vm4 = vcmp.eq.f32.partialorder %v1361_v9, 8.507059e+37  ;;  %v1330_v13 = vsel %vm3222_vm11, %v3090_v56, %v1326_v52  ;;  %v3239_v44 = vadd.f32 1.0, %v2463_v14  ;;  %v1334_v19 = vor.u32 1.1754944e-38, %v1333_v5  ;;  %vm3288_vm14 = vmor %vm1237_vm9, %vm1238_vm15 }
 0x1d1   : > { %1977 = vmatpush.msrb.mxu0 %v1395_v8  ;;  %v1365_v22 = vsel %vm1362_vm4, %v1364_v54, %v1360_v21  ;;  %v1273_v56 = vand.u32 2147483648, %v2950_v32  ;;  %2470 = vrcp.f32 %v3207_v39  ;;  %vm1332_vm13 = vcmp.eq.f32.partialorder %v1331_v43, 8.507059e+37  ;;  %vm3310_vm15 = vmor %vm1207_vm1, %vm1208_vm6 }
 0x1d2   : > { %v3241_v16 = vpop.f32.mrf.mxu2  ;;  %v1300_v52 = vsel %vm3249_vm12, %v3055_v17, %v1296_v40  ;;  %v1271_v14 = vand.u32 2147483647, %v2950_v32  ;;  %vm1147_vm11 = vweird.f32 %v2883_v33  ;;  %vm1118_vm4 = vweird.f32 %v2915_v26  ;;  %vm3341_vm1 = vmor %vm1177_vm2, %vm1178_vm10 }
 0x1d3   : > { %v3243_v6 = vpop.f32.mrf.mxu3  ;;  %1978 = vmatpush.msrb.mxu0 %v1365_v22  ;;  %2472 = vrcp.f32 %v3138_v1  ;;  %v3263_v29 = vadd.f32 1.0, %v3161_v11  ;;  %v1335_v9 = vsel %vm1332_vm13, %v1334_v19, %v1330_v13  ;;  %v1304_v4 = vor.u32 1.1754944e-38, %v1303_v23  ;;  %vm3374_vm2 = vmor %vm1147_vm11, %vm1148_vm5 }
 0x1d4   : > { %vm1088_vm7 = vweird.f32 %v2879_v27  ;;  %2474 = vrcp.f32 %v3231_v42  ;;  %v4794_v17 = vand.u32 2147483647, %v2962_v41  ;;  %v1270_v11 = vsel %vm3269_vm3, %v3046_v20, %v1266_v61 }
 0x1d5   : > { %1979 = vmatpush.msrb.mxu0 %v1335_v9  ;;  %v1206_v48 = vadd.f32 %v3021_v50, %v3136_v0  ;;  %vm1117_vm8 = vweird.f32 %v2836_v57  ;;  %2476 = vrcp.f32 %v3239_v44  ;;  %v1274_v18 = vor.u32 1.1754944e-38, %v1273_v56  ;;  %v3294_v20 = vpop.eup %2468 }
 0x1d6   : > { %vm1302_vm12 = vcmp.eq.f32.partialorder %v4794_v17, 8.507059e+37  ;;  %v1213_v43 = vand.u32 2147483648, %v2939_v12  ;;  %vm1087_vm13 = vweird.f32 %v2809_v38  ;;  %vm1272_vm3 = vcmp.eq.f32.partialorder %v1271_v14, 8.507059e+37  ;;  %vm3395_vm5 = vmor %vm1117_vm8, %vm1118_vm4 }
 0x1d7   : > { %v1305_v32 = vsel %vm1302_vm12, %v1304_v4, %v1300_v52  ;;  %v1240_v0 = vsel %vm3288_vm14, %v3036_v63, %v3149_v55  ;;  %v1211_v5 = vand.u32 2147483647, %v2939_v12  ;;  %v1176_v21 = vadd.f32 %v2990_v59, %v3122_v34  ;;  %v3315_v55 = vpop.eup %2470  ;;  %vm3410_vm11 = vmor %vm1087_vm13, %vm1088_vm7 }
 0x1d8   : > { %1980 = vmatpush.msrb.mxu0 %v1305_v32  ;;  %2478 = vrcp.f32 %v3263_v29  ;;  %v1275_v40 = vsel %vm1272_vm3, %v1274_v18, %v1270_v11  ;;  %v4797_v49 = vand.u32 2147483648, %v2945_v60  ;;  %v1183_v63 = vand.u32 2147483648, %v2910_v46 }
 0x1d9   : > { %v4800_v34 = vand.u32 2147483647, %v2945_v60  ;;  %v1210_v45 = vsel %vm3310_vm15, %v3021_v50, %v1206_v48  ;;  %v1181_v23 = vand.u32 2147483647, %v2910_v46  ;;  %v1146_v12 = vadd.f32 %v2959_v37, %v3111_v36  ;;  %v3331_v22 = vpop.eup %2472 }
 0x1da   : > { %v1244_v8 = vor.u32 1.1754944e-38, %v4797_v49  ;;  %1981 = vmatpush.msrb.mxu0 %v1275_v40  ;;  %v4801_v61 = vand.u32 2147483647, %v2836_v57  ;;  %v3333_v19 = vpop.f32.mrf.mxu2  ;;  %v1214_v56 = vor.u32 1.1754944e-38, %v1213_v43  ;;  %v4806_v36 = vand.u32 2147483647, %v2883_v33  ;;  %v3353_v9 = vpop.eup %2474 }
 0x1db   : > { %vm1242_vm9 = vcmp.eq.f32.partialorder %v4800_v34, 8.507059e+37  ;;  %v3335_v60 = vpop.f32.mrf.mxu3  ;;  %v1428_v14 = vmul.f32 %v3294_v20, %v3190_v3  ;;  %vm1212_vm14 = vcmp.eq.f32.partialorder %v1211_v5, 8.507059e+37  ;;  %v1180_v46 = vsel %vm3341_vm1, %v2990_v59, %v1176_v21  ;;  %v3368_v32 = vpop.eup %2476 }
 0x1dc   : > { %vm3327_vm6 = vcmp.eq.f32.partialorder %v4801_v61, 8.507059e+37  ;;  %v1245_v58 = vsel %vm1242_vm9, %v1244_v8, %v1240_v0  ;;  %vm3347_vm12 = vcmp.eq.f32.partialorder %v4806_v36, 8.507059e+37  ;;  %v4809_v4 = vand.u32 2147483648, %v2883_v33  ;;  %v1923_v61 = vld [vmem:[%s4694_s3 + $0x8] sm:$0xff] }
 0x1dd   : > { %1982 = vmatpush.msrb.mxu0 %v1245_v58  ;;  %v1116_v17 = vadd.f32 %v2915_v26, %v3096_v62  ;;  %v4810_v11 = vand.u32 2147483647, %v2809_v38  ;;  %v1215_v18 = vsel %vm1212_vm14, %v1214_v56, %v1210_v45  ;;  %v1184_v41 = vor.u32 1.1754944e-38, %v1183_v63  ;;  %2317 = vmatmul.msk.f32.gmra.mxu1 %vm267_vm0, %v1923_v61 }
 0x1de   : > { %v1154_v35 = vor.u32 1.1754944e-38, %v4809_v4  ;;  %v1398_v62 = vmul.f32 %v3315_v55, %v3207_v39  ;;  %v1128_v43 = vmul.f32 %v3103_v31, %v3024_v24  ;;  %vm1182_vm3 = vcmp.eq.f32.partialorder %v1181_v23, 8.507059e+37  ;;  %v3389_v21 = vpop.eup %2478  ;;  %2315 = vmatmul.msk.f32.gmra.mxu0 %vm267_vm0, %v1923_v61 }
 0x1df   : > { %vm3364_vm10 = vcmp.eq.f32.partialorder %v4810_v11, 8.507059e+37  ;;  %1983 = vmatpush.msrb.mxu0 %v1215_v18  ;;  %v1150_v0 = vsel %vm3374_vm2, %v2959_v37, %v1146_v12  ;;  %v1188_v5 = vmul.f32 %v3131_v15, %v3058_v10  ;;  %v1158_v33 = vmul.f32 %v3117_v25, %v3038_v7 }
 0x1e0   : > { %v1185_v40 = vsel %vm1182_vm3, %v1184_v41, %v1180_v46  ;;  %v1429_v8 = vsub.f32 1.0, %v1428_v14  ;;  %v1368_v37 = vmul.f32 %v3353_v9, %v3231_v42  ;;  %v1218_v54 = vmul.f32 %v3142_v2, %v3084_v47  ;;  %v4820_v41 = vld [vmem:[#allocation17_spill] sm:$0xff] }
 0x1e1   : > { %1984 = vmatpush.msrb.mxu0 %v1185_v40  ;;  %v1120_v63 = vsel %vm3395_vm5, %v2915_v26, %v1116_v17  ;;  %v1338_v34 = vmul.f32 %v3368_v32, %v3239_v44  ;;  %v1278_v45 = vmul.f32 %v3331_v22, %v3138_v1  ;;  %v1248_v23 = vmul.f32 %v3155_v28, %v3098_v53  ;;  %v4824_v40 = vld [vmem:[#allocation12_spill] sm:$0xff] }
 0x1e2   : > { %v1155_v26 = vsel %vm3347_vm12, %v1154_v35, %v1150_v0  ;;  %v1090_v38 = vsel %vm3410_vm11, %v2879_v27, %v3073_v30  ;;  %v1399_v12 = vsub.f32 1.0, %v1398_v62  ;;  %v1099_v58 = vsub.f32 1.0, %v3077_v51  ;;  %v3433_v14 = vpop.f32.mrf.mxu2  ;;  %v4819_v27 = vld [vmem:[#allocation23_spill] sm:$0xff]  ;;  %v4823_v0 = vld [vmem:[#allocation18_spill] sm:$0xff] }
 0x1e3   : > { %1985 = vmatpush.msrb.mxu0 %v1155_v26  ;;  %v1308_v56 = vmul.f32 %v3389_v21, %v3263_v29  ;;  %v1189_v50 = vsub.f32 1.0, %v1188_v5  ;;  %v1159_v36 = vsub.f32 1.0, %v1158_v33  ;;  %v1129_v52 = vsub.f32 1.0, %v1128_v43  ;;  %v3435_v46 = vpop.f32.mrf.mxu3  ;;  %v4822_v62 = vld [vmem:[#allocation11_spill] sm:$0xff] }
 0x1e4   : > { %v1125_v30 = vsel %vm3327_vm6, %v4819_v27, %v1120_v63  ;;  %v1430_v4 = vmul.f32 %v3294_v20, %v1429_v8  ;;  %v1369_v51 = vsub.f32 1.0, %v1368_v37  ;;  %v1219_v35 = vsub.f32 1.0, %v1218_v54 }
 0x1e5   : > { %1986 = vmatpush.msrb.mxu0 %v1125_v30  ;;  %v1339_v17 = vsub.f32 1.0, %v1338_v34  ;;  %v1279_v11 = vsub.f32 1.0, %v1278_v45  ;;  %v1249_v18 = vsub.f32 1.0, %v1248_v23  ;;  %v4821_v59 = vsub.f32 1.0, %v4820_v41  ;;  %v4825_v45 = vld [vmem:[#allocation20_spill] sm:$0xff] }
 0x1e6   : > { %v1095_v13 = vsel %vm3364_vm10, %v4823_v0, %v1090_v38  ;;  %v1400_v5 = vmul.f32 %v3315_v55, %v1399_v12  ;;  %v1166_v33 = vand.u32 2147483647, %v3038_v7  ;;  %v3453_v49 = vmul.f32 %v4824_v40, %v1099_v58 }
 0x1e7   : > { %v3445_v43 = vmul.f32 %v4822_v62, %v4821_v59  ;;  %1987 = vmatpush.msrb.mxu0 %v1095_v13  ;;  %v1309_v8 = vsub.f32 1.0, %v1308_v56  ;;  %v3456_v37 = vmul.f32 %v3131_v15, %v1189_v50  ;;  %v3459_v54 = vmul.f32 %v3117_v25, %v1159_v36  ;;  %v4826_v56 = vld [vmem:[#allocation16_spill] sm:$0xff]  ;;  %v4832_v59 = vld [vmem:[#allocation13_spill] sm:$0xff] }
 0x1e8   : > { %v3462_v63 = vmul.f32 %v3103_v31, %v1129_v52  ;;  %v1431_v48 = vadd.f32 %v3294_v20, %v1430_v4  ;;  %vm1433_vm0 = vweird.f32 %v3294_v20  ;;  %v1370_v57 = vmul.f32 %v3353_v9, %v1369_v51 }
 0x1e9   : > { %v3468_v34 = vmul.f32 %v3142_v2, %v1219_v35  ;;  %1988 = vmatpush.msrb.mxu0 %v4825_v45  ;;  %v1438_v23 = vand.u32 2147483648, %v3190_v3  ;;  %v1340_v26 = vmul.f32 %v3368_v32, %v1339_v17  ;;  %v1280_v38 = vmul.f32 %v3331_v22, %v1279_v11  ;;  %v4829_v35 = vld [vmem:[#allocation14_spill] sm:$0xff] }
 0x1ea   : > { %v3475_v12 = vmul.f32 %v3155_v28, %v1249_v18  ;;  %vm1432_vm4 = vweird.f32 %v3190_v3  ;;  %v1436_v61 = vand.u32 2147483647, %v3190_v3  ;;  %v1401_v58 = vadd.f32 %v3315_v55, %v1400_v5  ;;  %v3491_v52 = vpop.f32.mrf.mxu2 }
 0x1eb   : > { %vm1403_vm7 = vweird.f32 %v3315_v55  ;;  %vm1283_vm8 = vweird.f32 %v3331_v22  ;;  %1989 = vmatpush.msrb.mxu0 %v4826_v56  ;;  %vm3483_vm13 = vmor %vm1432_vm4, %vm1433_vm0  ;;  %vm1402_vm15 = vweird.f32 %v3207_v39  ;;  %v1408_v36 = vand.u32 2147483648, %v3207_v39  ;;  %v3493_v27 = vpop.f32.mrf.mxu3 }
 0x1ec   : > { %vm1342_vm9 = vweird.f32 %v3239_v44  ;;  %v1310_v3 = vmul.f32 %v3389_v21, %v1309_v8  ;;  %v1435_v30 = vsel %vm3483_vm13, %v3294_v20, %v1431_v48  ;;  %v1406_v4 = vand.u32 2147483647, %v3207_v39  ;;  %vm3505_vm12 = vmor %vm1402_vm15, %vm1403_vm7 }
 0x1ed   : > { %v1371_v51 = vadd.f32 %v3353_v9, %v1370_v57  ;;  %vm1373_vm6 = vweird.f32 %v3353_v9  ;;  %vm1253_vm1 = vweird.f32 %v3155_v28  ;;  %1990 = vmatpush.msrb.mxu0 %v4829_v35  ;;  %v1439_v17 = vor.u32 1.1754944e-38, %v1438_v23 }
 0x1ee   : > { %vm1372_vm14 = vweird.f32 %v3231_v42  ;;  %v1376_v20 = vand.u32 2147483647, %v3231_v42  ;;  %v1378_v39 = vand.u32 2147483648, %v3231_v42  ;;  %vm1437_vm10 = vcmp.eq.f32.partialorder %v1436_v61, 8.507059e+37 }
 0x1ef   : > { %v1405_v18 = vsel %vm3505_vm12, %v3315_v55, %v1401_v58  ;;  %v1341_v41 = vadd.f32 %v3368_v32, %v1340_v26  ;;  %vm1343_vm2 = vweird.f32 %v3368_v32  ;;  %vm1252_vm3 = vweird.f32 %v3098_v53  ;;  %1991 = vmatpush.msrb.mxu0 %v4832_v59  ;;  %vm3521_vm5 = vmor %vm1372_vm14, %vm1373_vm6 }
 0x1f0   : > { %v1440_v0 = vsel %vm1437_vm10, %v1439_v17, %v1435_v30  ;;  %v1409_v13 = vor.u32 1.1754944e-38, %v1408_v36  ;;  %v1346_v42 = vand.u32 2147483647, %v3239_v44  ;;  %v1348_v55 = vand.u32 2147483648, %v3239_v44  ;;  %vm3537_vm7 = vmor %vm1342_vm9, %vm1343_vm2 }
 0x1f1   : > { %2022 = vmatpush.msra.mxu0 %v1440_v0  ;;  %vm1407_vm11 = vcmp.eq.f32.partialorder %v1406_v4, 8.507059e+37  ;;  %v1375_v8 = vsel %vm3521_vm5, %v3353_v9, %v1371_v51  ;;  %v1311_v48 = vadd.f32 %v3389_v21, %v1310_v3  ;;  %vm1313_vm0 = vweird.f32 %v3389_v21 }
 0x1f2   : > { %vm1222_vm4 = vweird.f32 %v3084_v47  ;;  %v1410_v57 = vsel %vm1407_vm11, %v1409_v13, %v1405_v18  ;;  %v1379_v45 = vor.u32 1.1754944e-38, %v1378_v39  ;;  %vm1312_vm13 = vweird.f32 %v3263_v29  ;;  %v3557_v3 = vpop.f32.mrf.mxu2  ;;  %v4866_v13 = vld [vmem:[#allocation8_spill] sm:$0xff] }
 0x1f3   : > { %v1318_v9 = vand.u32 2147483648, %v3263_v29  ;;  %2023 = vmatpush.msra.mxu0 %v1410_v57  ;;  %vm1377_vm15 = vcmp.eq.f32.partialorder %v1376_v20, 8.507059e+37  ;;  %v1345_v26 = vsel %vm3537_vm7, %v3368_v32, %v1341_v41  ;;  %v1316_v61 = vand.u32 2147483647, %v3263_v29  ;;  %vm3551_vm9 = vmor %vm1312_vm13, %vm1313_vm0  ;;  %v3559_v32 = vpop.f32.mrf.mxu3 }
 0x1f4   : > { %v1281_v58 = vadd.f32 %v3331_v22, %v1280_v38  ;;  %vm1192_vm6 = vweird.f32 %v3058_v10  ;;  %v1380_v44 = vsel %vm1377_vm15, %v1379_v45, %v1375_v8  ;;  %v1349_v56 = vor.u32 1.1754944e-38, %v1348_v55  ;;  %vm3587_vm0 = vmor %vm1252_vm3, %vm1253_vm1 }
 0x1f5   : > { %vm1282_vm12 = vweird.f32 %v3138_v1  ;;  %v1288_v36 = vand.u32 2147483648, %v3138_v1  ;;  %2024 = vmatpush.msra.mxu0 %v1380_v44  ;;  %vm1347_vm14 = vcmp.eq.f32.partialorder %v1346_v42, 8.507059e+37  ;;  %v1315_v29 = vsel %vm3551_vm9, %v3389_v21, %v1311_v48 }
 0x1f6   : > { %v1286_v38 = vand.u32 2147483647, %v3138_v1  ;;  %v1251_v30 = vadd.f32 %v3155_v28, %v3475_v12  ;;  %vm1162_vm10 = vweird.f32 %v3038_v7  ;;  %v1350_v4 = vsel %vm1347_vm14, %v1349_v56, %v1345_v26  ;;  %vm3570_vm2 = vmor %vm1282_vm12, %vm1283_vm8  ;;  %v4850_v26 = vld [vmem:[#allocation5_spill] sm:$0xff] }
 0x1f7   : > { %v1319_v51 = vor.u32 1.1754944e-38, %v1318_v9  ;;  %v1256_v17 = vand.u32 2147483647, %v3098_v53  ;;  %v1258_v11 = vand.u32 2147483648, %v3098_v53  ;;  %2025 = vmatpush.msra.mxu0 %v1350_v4  ;;  %vm1317_vm5 = vcmp.eq.f32.partialorder %v1316_v61, 8.507059e+37  ;;  %v4843_v53 = vld [vmem:[#allocation7_spill] sm:$0xff] }
 0x1f8   : > { %v1285_v1 = vsel %vm3570_vm2, %v3331_v22, %v1281_v58  ;;  %v1221_v21 = vadd.f32 %v3142_v2, %v3468_v34  ;;  %vm1223_vm11 = vweird.f32 %v3142_v2  ;;  %vm1132_vm8 = vweird.f32 %v3024_v24  ;;  %v4878_v4 = vld [vmem:[#allocation25_spill] sm:$0xff] }
 0x1f9   : > { %v1320_v12 = vsel %vm1317_vm5, %v1319_v51, %v1315_v29  ;;  %v1289_v20 = vor.u32 1.1754944e-38, %v1288_v36  ;;  %v1226_v18 = vand.u32 2147483647, %v3084_v47  ;;  %v1228_v22 = vand.u32 2147483648, %v3084_v47  ;;  %vm3604_vm3 = vmor %vm1222_vm4, %vm1223_vm11  ;;  %v4846_v47 = vld [vmem:[#allocation6_spill] sm:$0xff]  ;;  %v4853_v36 = vld [vmem:[#allocation4_spill] sm:$0xff] }
 0x1fa   : > { %2026 = vmatpush.msra.mxu0 %v1320_v12  ;;  %vm1287_vm7 = vcmp.eq.f32.partialorder %v1286_v38, 8.507059e+37  ;;  %v1255_v34 = vsel %vm3587_vm0, %v3155_v28, %v1251_v30  ;;  %v1191_v41 = vadd.f32 %v3131_v15, %v3456_v37  ;;  %vm1193_vm13 = vweird.f32 %v3131_v15  ;;  %v3628_v45 = vpop.f32.mrf.mxu2  ;;  %v4854_v29 = vld [vmem:[#allocation3_spill] sm:$0xff] }
 0x1fb   : > { %vm1102_vm1 = vweird.f32 %v4843_v53  ;;  %v1290_v59 = vsel %vm1287_vm7, %v1289_v20, %v1285_v1  ;;  %v1259_v0 = vor.u32 1.1754944e-38, %v1258_v11  ;;  %v1196_v5 = vand.u32 2147483647, %v3058_v10  ;;  %vm3621_vm12 = vmor %vm1192_vm6, %vm1193_vm13  ;;  %v3630_v23 = vpop.f32.mrf.mxu3  ;;  %v4860_v11 = vld [vmem:[#allocation24_spill] sm:$0xff] }
 0x1fc   : > { %v1198_v28 = vand.u32 2147483648, %v3058_v10  ;;  %2027 = vmatpush.msra.mxu0 %v1290_v59  ;;  %vm1257_vm15 = vcmp.eq.f32.partialorder %v1256_v17, 8.507059e+37  ;;  %v1225_v37 = vsel %vm3604_vm3, %v3142_v2, %v1221_v21  ;;  %v1161_v42 = vadd.f32 %v3117_v25, %v3459_v54  ;;  %v4849_v2 = vld [vmem:[#allocation21_spill] sm:$0xff] }
 0x1fd   : > { %vm1163_vm9 = vweird.f32 %v3117_v25  ;;  %vm1072_vm4 = vweird.f32 %v4846_v47  ;;  %v1260_v55 = vsel %vm1257_vm15, %v1259_v0, %v1255_v34  ;;  %v1229_v8 = vor.u32 1.1754944e-38, %v1228_v22  ;;  %v4865_v0 = vld [vmem:[#allocation15_spill] sm:$0xff] }
 0x1fe   : > { %v1168_v57 = vand.u32 2147483648, %v3038_v7  ;;  %vm1133_vm14 = vweird.f32 %v3103_v31  ;;  %v2282_v54 = vmul.f32 -1.442695, %v4849_v2  ;;  %2028 = vmatpush.msra.mxu0 %v1260_v55  ;;  %vm1227_vm2 = vcmp.eq.f32.partialorder %v1226_v18, 8.507059e+37  ;;  %vm3642_vm5 = vmor %vm1162_vm10, %vm1163_vm9  ;;  %v4871_v2 = vld [vmem:[#allocation10_spill] sm:$0xff] }
 0x1ff   : > { %v1195_v10 = vsel %vm3621_vm12, %v3131_v15, %v1191_v41  ;;  %v1131_v9 = vadd.f32 %v3103_v31, %v3462_v63  ;;  %vm1042_vm6 = vweird.f32 %v4850_v26  ;;  %v1230_v61 = vsel %vm1227_vm2, %v1229_v8, %v1225_v37  ;;  %vm3660_vm13 = vmor %vm1132_vm8, %vm1133_vm14 }
 0x200   : > { %v1199_v58 = vor.u32 1.1754944e-38, %v1198_v28  ;;  %v1136_v56 = vand.u32 2147483647, %v3024_v24  ;;  %v1138_v50 = vand.u32 2147483648, %v3024_v24  ;;  %2029 = vmatpush.msra.mxu0 %v1230_v61  ;;  %vm1197_vm11 = vcmp.eq.f32.partialorder %v1196_v5, 8.507059e+37  ;;  %v4867_v28 = vld [vmem:[#allocation22_spill] sm:$0xff] }
 0x201   : > { %v1165_v15 = vsel %vm3642_vm5, %v3117_v25, %v1161_v42  ;;  %v1101_v63 = vadd.f32 %v4824_v40, %v3453_v49  ;;  %vm1103_vm0 = vweird.f32 %v4824_v40  ;;  %vm1012_vm10 = vweird.f32 %v4853_v36 }
 0x202   : > { %vm983_vm7 = vweird.f32 %v4854_v29  ;;  %v1200_v38 = vsel %vm1197_vm11, %v1199_v58, %v1195_v10  ;;  %v1169_v30 = vor.u32 1.1754944e-38, %v1168_v57  ;;  %v1108_v25 = vand.u32 2147483648, %v4843_v53  ;;  %vm3677_vm8 = vmor %vm1102_vm1, %vm1103_vm0  ;;  %v3699_v34 = vpop.f32.mrf.mxu2  ;;  %v4872_v10 = vld [vmem:[#allocation26_spill] sm:$0xff] }
 0x203   : > { %vm1073_vm3 = vweird.f32 %v4822_v62  ;;  %2480 = vpow2.f32 %v2282_v54  ;;  %2030 = vmatpush.msra.mxu0 %v1200_v38  ;;  %vm1167_vm15 = vcmp.eq.f32.partialorder %v1166_v33, 8.507059e+37  ;;  %v1135_v49 = vsel %vm3660_vm13, %v3103_v31, %v1131_v9  ;;  %v4859_v33 = vld [vmem:[#allocation9_spill] sm:$0xff] }
 0x204   : > { %v1071_v24 = vadd.f32 %v4822_v62, %v3445_v43  ;;  %v1170_v51 = vsel %vm1167_vm15, %v1169_v30, %v1165_v15  ;;  %v1139_v35 = vor.u32 1.1754944e-38, %v1138_v50  ;;  %v1078_v7 = vand.u32 2147483648, %v4846_v47  ;;  %v4861_v43 = vld [vmem:[#allocation19_spill] sm:$0xff]  ;;  %vm3693_vm1 = vmor %vm1072_vm4, %vm1073_vm3 }
 0x205   : > { %vm1043_vm9 = vweird.f32 %v4859_v33  ;;  %v2284_v1 = vmul.f32 -1.442695, %v4860_v11  ;;  %2031 = vmatpush.msra.mxu0 %v1170_v51  ;;  %vm1137_vm12 = vcmp.eq.f32.partialorder %v1136_v56, 8.507059e+37  ;;  %v1105_v31 = vsel %vm3677_vm8, %v4824_v40, %v1101_v63  ;;  %v3701_v40 = vpop.f32.mrf.mxu3  ;;  %v4880_v51 = vld [vmem:[#allocation27_spill] sm:$0xff] }
 0x206   : > { %v1041_v21 = vadd.f32 %v4859_v33, %v4861_v43  ;;  %v1140_v12 = vsel %vm1137_vm12, %v1139_v35, %v1135_v49  ;;  %v1109_v20 = vor.u32 1.1754944e-38, %v1108_v25  ;;  %v1046_v18 = vand.u32 2147483647, %v4850_v26  ;;  %vm3716_vm2 = vmor %vm1042_vm6, %vm1043_vm9 }
 0x207   : > { %v1048_v22 = vand.u32 2147483648, %v4850_v26  ;;  %2032 = vmatpush.msra.mxu0 %v1140_v12  ;;  %v4864_v41 = vand.u32 2147483647, %v4843_v53  ;;  %v1075_v59 = vsel %vm3693_vm1, %v4822_v62, %v1071_v24  ;;  %v1011_v5 = vadd.f32 %v4866_v13, %v4865_v0 }
 0x208   : > { %vm1013_vm4 = vweird.f32 %v4866_v13  ;;  %v2283_v37 = vmul.f32 -1.442695, %v4867_v28  ;;  %v1079_v55 = vor.u32 1.1754944e-38, %v1078_v7  ;;  %v1018_v8 = vand.u32 2147483648, %v4853_v36 }
 0x209   : > { %vm1107_vm14 = vcmp.eq.f32.partialorder %v4864_v41, 8.507059e+37  ;;  %v2481_v62 = vpop.eup %2480  ;;  %2482 = vpow2.f32 %v2284_v1  ;;  %v4870_v48 = vand.u32 2147483647, %v4846_v47  ;;  %v1045_v57 = vsel %vm3716_vm2, %v4859_v33, %v1041_v21  ;;  %vm3733_vm6 = vmor %vm1012_vm10, %vm1013_vm4  ;;  %v4875_v47 = vld [vmem:[#allocation2_spill] sm:$0xff] }
 0x20a   : > { %v1110_v42 = vsel %vm1107_vm14, %v1109_v20, %v1105_v31  ;;  %v981_v54 = vadd.f32 %v4854_v29, %v4871_v2  ;;  %v2286_v9 = vmul.f32 -1.442695, %v4872_v10  ;;  %v1049_v61 = vor.u32 1.1754944e-38, %v1048_v22  ;;  %v3758_v11 = vpop.f32.mrf.mxu2 }
 0x20b   : > { %2033 = vmatpush.msra.mxu0 %v1110_v42  ;;  %vm1077_vm5 = vcmp.eq.f32.partialorder %v4870_v48, 8.507059e+37  ;;  %v988_v44 = vand.u32 2147483648, %v4875_v47  ;;  %vm1047_vm11 = vcmp.eq.f32.partialorder %v1046_v18, 8.507059e+37  ;;  %v1015_v56 = vsel %vm3733_vm6, %v4866_v13, %v1011_v5 }
 0x20c   : > { %v1080_v26 = vsel %vm1077_vm5, %v1079_v55, %v1075_v59  ;;  %vm982_vm0 = vweird.f32 %v4875_v47  ;;  %v986_v50 = vand.u32 2147483647, %v4875_v47  ;;  %v3743_v15 = vadd.f32 1.0, %v2481_v62 }
 0x20d   : > { %2034 = vmatpush.msra.mxu0 %v1080_v26  ;;  %2484 = vpow2.f32 %v2283_v37  ;;  %v1050_v63 = vsel %vm1047_vm11, %v1049_v61, %v1045_v57  ;;  %v1019_v38 = vor.u32 1.1754944e-38, %v1018_v8  ;;  %vm3747_vm10 = vmor %vm982_vm0, %vm983_vm7  ;;  %v2285_v25 = vmul.f32 -1.442695, %v4878_v4 }
 0x20e   : > { %v4879_v49 = vand.u32 2147483647, %v4853_v36  ;;  %v985_v24 = vsel %vm3747_vm10, %v4854_v29, %v981_v54  ;;  %2486 = vpow2.f32 %v2286_v9  ;;  %v2287_v35 = vmul.f32 -1.442695, %v4880_v51  ;;  %v3762_v36 = vpop.f32.mrf.mxu3 }
 0x20f   : > { %2035 = vmatpush.msra.mxu0 %v1050_v63  ;;  %v989_v7 = vor.u32 1.1754944e-38, %v988_v44  ;;  %v2483_v33 = vpop.eup %2482  ;;  %vm987_vm7 = vcmp.eq.f32.partialorder %v986_v50, 8.507059e+37  ;;  %2488 = vrcp.f32 %v3743_v15  ;;  %v2288_v1 = vmul.f32 -1.442695, %v3241_v16 }
 0x210   : > { %vm1017_vm13 = vcmp.eq.f32.partialorder %v4879_v49, 8.507059e+37  ;;  %2490 = vpow2.f32 %v2285_v25  ;;  %v2289_v29 = vmul.f32 -1.442695, %v3243_v6  ;;  %v3765_v21 = vadd.f32 1.0, %v2483_v33 }
 0x211   : > { %v1020_v17 = vsel %vm1017_vm13, %v1019_v38, %v1015_v56  ;;  %v990_v31 = vsel %vm987_vm7, %v989_v7, %v985_v24  ;;  %2492 = vpow2.f32 %v2287_v35  ;;  %v2290_v12 = vmul.f32 -1.442695, %v3333_v19 }
 0x212   : > { %2036 = vmatpush.msra.mxu0 %v1020_v17  ;;  %2494 = vpow2.f32 %v2288_v1  ;;  %v2291_v16 = vmul.f32 -1.442695, %v3335_v60  ;;  %v578_v41 = vpop.f32.mrf.mxu2  ;;  %v2292_v42 = vmul.f32 -1.442695, %v3433_v14  ;;  %v1453_v48 = vand.u32 2147483648, %v3743_v15 }
 0x213   : > { %v2485_v43 = vpop.eup %2484  ;;  %2496 = vpow2.f32 %v2289_v29  ;;  %v2294_v2 = vmul.f32 -1.442695, %v3491_v52  ;;  %v1451_v26 = vand.u32 2147483647, %v3743_v15  ;;  %v2293_v58 = vmul.f32 -1.442695, %v3435_v46 }
 0x214   : > { %2037 = vmatpush.msra.mxu0 %v990_v31  ;;  %v2487_v20 = vpop.eup %2486  ;;  %v3768_v39 = vadd.f32 1.0, %v2485_v43  ;;  %2498 = vrcp.f32 %v3765_v21  ;;  %vm1447_vm3 = vweird.f32 %v3743_v15  ;;  %v2296_v52 = vmul.f32 -1.442695, %v3557_v3 }
 0x215   : > { %v3770_v18 = vpop.eup %2488  ;;  %v3774_v6 = vadd.f32 1.0, %v2487_v20  ;;  %2500 = vpow2.f32 %v2290_v12  ;;  %v1454_v44 = vor.u32 1.1754944e-38, %v1453_v48  ;;  %v1483_v63 = vand.u32 2147483648, %v3765_v21 }
 0x216   : > { %4881 = vst [vmem:[#allocation23_spill] sm:$0xff] %v3768_v39  ;;  %v2491_v22 = vpop.eup %2490  ;;  %2502 = vrcp.f32 %v3768_v39  ;;  %v3779_v13 = vpop.f32.mrf.mxu3  ;;  %v1443_v5 = vmul.f32 %v3770_v18, %v3743_v15  ;;  %v2298_v46 = vmul.f32 -1.442695, %v3628_v45  ;;  %vm3823_vm15 = vcmp.eq.f32.partialorder %v1451_v26, 8.507059e+37 }
 0x217   : > { %v2493_v59 = vpop.eup %2492  ;;  %v3777_v0 = vadd.f32 1.0, %v2491_v22  ;;  %2504 = vpow2.f32 %v2291_v16  ;;  %v2300_v24 = vmul.f32 -1.442695, %v3699_v34  ;;  %vm1477_vm8 = vweird.f32 %v3765_v21 }
 0x218   : > { %v2495_v19 = vpop.eup %2494  ;;  %2506 = vrcp.f32 %v3774_v6  ;;  %v3784_v60 = vadd.f32 1.0, %v2493_v59  ;;  %v1444_v62 = vsub.f32 1.0, %v1443_v5  ;;  %v1481_v45 = vand.u32 2147483647, %v3765_v21 }
 0x219   : > { %4882 = vst [vmem:[#allocation17_spill] sm:$0xff] %v3777_v0  ;;  %v2497_v28 = vpop.eup %2496  ;;  %v3789_v53 = vadd.f32 1.0, %v2495_v19  ;;  %2508 = vrcp.f32 %v3777_v0  ;;  %v2302_v35 = vmul.f32 -1.442695, %v3758_v11  ;;  %vm1448_vm9 = vweird.f32 %v3770_v18 }
 0x21a   : > { %4883 = vst [vmem:[#allocation11_spill] sm:$0xff] %v3784_v60  ;;  %v3786_v37 = vpop.eup %2498  ;;  %v3792_v8 = vadd.f32 1.0, %v2497_v28  ;;  %2510 = vrcp.f32 %v3784_v60  ;;  %v581_v54 = vpop.f32.mrf.mxu2  ;;  %v1445_v47 = vmul.f32 %v3770_v18, %v1444_v62  ;;  %v2304_v33 = vmul.f32 -1.442695, %v578_v41  ;;  %vm3853_vm12 = vmor %vm1447_vm3, %vm1448_vm9 }
 0x21b   : > { %v2501_v55 = vpop.eup %2500  ;;  %v1473_v14 = vmul.f32 %v3786_v37, %v3765_v21  ;;  %2512 = vpow2.f32 %v2292_v42  ;;  %v3841_v31 = vor.u32 1.1754944e-38, %v1483_v63  ;;  %v1511_v22 = vand.u32 2147483647, %v3774_v6 }
 0x21c   : > { %4884 = vst [vmem:[#allocation18_spill] sm:$0xff] %v3792_v8  ;;  %v3795_v57 = vpop.eup %2502  ;;  %v3801_v9 = vadd.f32 1.0, %v2501_v55  ;;  %2514 = vrcp.f32 %v3789_v53  ;;  %v1446_v17 = vadd.f32 %v3770_v18, %v1445_v47  ;;  %v1513_v59 = vand.u32 2147483648, %v3774_v6 }
 0x21d   : > { %4885 = vst [vmem:[#allocation12_spill] sm:$0xff] %v3795_v57  ;;  %v2505_v10 = vpop.eup %2504  ;;  %2516 = vrcp.f32 %v3792_v8  ;;  %v1474_v50 = vsub.f32 1.0, %v1473_v14  ;;  %v1458_v25 = vmul.f32 %v3795_v57, %v3768_v39  ;;  %v2295_v5 = vmul.f32 -1.442695, %v3493_v27 }
 0x21e   : > { %v3804_v61 = vpop.eup %2506  ;;  %v3812_v56 = vadd.f32 1.0, %v2505_v10  ;;  %2518 = vpow2.f32 %v2294_v2  ;;  %v3819_v30 = vpop.f32.mrf.mxu3  ;;  %vm3860_vm1 = vcmp.eq.f32.partialorder %v1481_v45, 8.507059e+37  ;;  %v1450_v42 = vsel %vm3853_vm12, %v3770_v18, %v1446_v17 }
 0x21f   : > { %v3815_v38 = vpop.eup %2508  ;;  %2520 = vrcp.f32 %v3801_v9  ;;  %v1503_v3 = vmul.f32 %v3804_v61, %v3774_v6  ;;  %v1475_v34 = vmul.f32 %v3786_v37, %v1474_v50  ;;  %v1459_v11 = vsub.f32 1.0, %v1458_v25 }
 0x220   : > { %4886 = vst [vmem:[#allocation20_spill] sm:$0xff] %v3812_v56  ;;  %v3829_v49 = vpop.eup %2510  ;;  %2522 = vpow2.f32 %v2293_v58  ;;  %v1488_v15 = vmul.f32 %v3815_v38, %v3777_v0  ;;  %v2306_v62 = vmul.f32 -1.442695, %v581_v54  ;;  %vm1478_vm14 = vweird.f32 %v3786_v37 }
 0x221   : > { %4887 = vst [vmem:[#allocation16_spill] sm:$0xff] %v3815_v38  ;;  %v2513_v51 = vpop.eup %2512  ;;  %2524 = vpow2.f32 %v2296_v52  ;;  %v1504_v12 = vsub.f32 1.0, %v1503_v3  ;;  %v1476_v48 = vadd.f32 %v3786_v37, %v1475_v34  ;;  %vm1507_vm4 = vweird.f32 %v3774_v6  ;;  %vm3897_vm5 = vmor %vm1477_vm8, %vm1478_vm14 }
 0x222   : > { %4890 = vst [vmem:[#allocation14_spill] sm:$0xff] %v3829_v49  ;;  %v3837_v7 = vpop.eup %2514  ;;  %2526 = vrcp.f32 %v3812_v56  ;;  %v584_v1 = vpop.f32.mrf.mxu2  ;;  %v3845_v16 = vadd.f32 1.0, %v2513_v51  ;;  %v2297_v10 = vmul.f32 -1.442695, %v3559_v32  ;;  %v1514_v26 = vor.u32 1.1754944e-38, %v1513_v59 }
 0x223   : > { %4891 = vst [vmem:[#allocation13_spill] sm:$0xff] %v3837_v7  ;;  %v3843_v29 = vpop.eup %2516  ;;  %2528 = vpow2.f32 %v2298_v46  ;;  %v2308_v43 = vmul.f32 -1.442695, %v584_v1  ;;  %v1505_v14 = vmul.f32 %v3804_v61, %v1504_v12  ;;  %v3883_v54 = vsel %vm3823_vm15, %v1454_v44, %v1450_v42 }
 0x224   : > { %4892 = vst [vmem:[#allocation7_spill] sm:$0xff] %v3843_v29  ;;  %v2519_v20 = vpop.eup %2518  ;;  %2530 = vpow2.f32 %v2300_v24  ;;  %v1533_v47 = vmul.f32 %v3837_v7, %v3789_v53  ;;  %vm3889_vm2 = vcmp.eq.f32.partialorder %v1511_v22, 8.507059e+37  ;;  %v1489_v44 = vsub.f32 1.0, %v1488_v15 }
 0x225   : > { %v3857_v19 = vpop.eup %2520  ;;  %2532 = vpow2.f32 %v2302_v35  ;;  %v3873_v2 = vadd.f32 1.0, %v2519_v20  ;;  %4898 = vst [vmem:[#allocation21_spill] sm:$0xff] %v3883_v54  ;;  %v3902_v63 = vmul.f32 %v3795_v57, %v1459_v11  ;;  %vm1508_vm6 = vweird.f32 %v3804_v61 }
 0x226   : > { %v3869_v55 = vpop.eup %2522  ;;  %2534 = vpow2.f32 %v2304_v33  ;;  %v3885_v52 = vpop.f32.mrf.mxu3  ;;  %v1480_v25 = vsel %vm3897_vm5, %v3786_v37, %v1476_v48  ;;  %v2299_v24 = vmul.f32 -1.442695, %v3630_v23  ;;  %v1506_v51 = vadd.f32 %v3804_v61, %v1505_v14  ;;  %vm3932_vm11 = vmor %vm1507_vm4, %vm1508_vm6 }
 0x227   : > { %v2525_v27 = vpop.eup %2524  ;;  %2536 = vpow2.f32 %v2308_v43  ;;  %4903 = vst [vmem:[#allocation5_spill] sm:$0xff] %v3902_v63  ;;  %v1543_v1 = vand.u32 2147483648, %v3789_v53  ;;  %v1534_v37 = vsub.f32 1.0, %v1533_v47  ;;  %v1518_v12 = vmul.f32 %v3829_v49, %v3784_v60 }
 0x228   : > { %v3877_v18 = vpop.eup %2526  ;;  %2538 = vrcp.f32 %v3845_v16  ;;  %v3904_v3 = vadd.f32 1.0, %v2525_v27  ;;  %v1563_v20 = vmul.f32 %v3857_v19, %v3801_v9  ;;  %v3939_v59 = vsel %vm3860_vm1, %v3841_v31, %v1480_v25 }
 0x229   : > { %4897 = vst [vmem:[#allocation6_spill] sm:$0xff] %v3877_v18  ;;  %v2529_v58 = vpop.eup %2528  ;;  %2540 = vpow2.f32 %v2295_v5  ;;  %v1573_v42 = vand.u32 2147483648, %v3801_v9  ;;  %vm1537_vm0 = vweird.f32 %v3789_v53  ;;  %v1510_v6 = vsel %vm3932_vm11, %v3804_v61, %v1506_v51 }
 0x22a   : > { %v2531_v46 = vpop.eup %2530  ;;  %2542 = vpow2.f32 %v2306_v62  ;;  %v587_v4 = vpop.f32.mrf.mxu2  ;;  %v3913_v17 = vadd.f32 1.0, %v2529_v58  ;;  %4906 = vst [vmem:[#allocation4_spill] sm:$0xff] %v3939_v59  ;;  %v3951_v28 = vor.u32 1.1754944e-38, %v1543_v1  ;;  %v3954_v31 = vmul.f32 %v3815_v38, %v1489_v44 }
 0x22b   : > { %v2533_v21 = vpop.eup %2532  ;;  %2544 = vrcp.f32 %v3873_v2  ;;  %v2310_v45 = vmul.f32 -1.442695, %v587_v4  ;;  %v3917_v43 = vadd.f32 1.0, %v2531_v46  ;;  %v1535_v27 = vmul.f32 %v3837_v7, %v1534_v37 }
 0x22c   : > { %v2535_v35 = vpop.eup %2534  ;;  %2546 = vpow2.f32 %v2297_v10  ;;  %v3924_v11 = vadd.f32 1.0, %v2533_v21  ;;  %4907 = vst [vmem:[#allocation3_spill] sm:$0xff] %v3951_v28  ;;  %vm1538_vm10 = vweird.f32 %v3837_v7  ;;  %v1519_v14 = vsub.f32 1.0, %v1518_v12 }
 0x22d   : > { %v2537_v34 = vpop.eup %2536  ;;  %2548 = vpow2.f32 %v2310_v45  ;;  %v3941_v5 = vadd.f32 1.0, %v2535_v35  ;;  %4908 = vst [vmem:[#allocation9_spill] sm:$0xff] %v3954_v31  ;;  %v1564_v58 = vsub.f32 1.0, %v1563_v20  ;;  %v3965_v32 = vsel %vm3889_vm2, %v1514_v26, %v1510_v6  ;;  %vm4020_vm13 = vmor %vm1537_vm0, %vm1538_vm10 }
 0x22e   : > { %v3921_v23 = vpop.eup %2538  ;;  %2550 = vrcp.f32 %v3904_v3  ;;  %v3949_v62 = vadd.f32 1.0, %v2537_v34  ;;  %4909 = vst [vmem:[#allocation24_spill] sm:$0xff] %v3965_v32  ;;  %v3970_v4 = vpop.f32.mrf.mxu3  ;;  %v3972_v21 = vor.u32 1.1754944e-38, %v1573_v42  ;;  %v2301_v45 = vmul.f32 -1.442695, %v3701_v40 }
 0x22f   : > { %v2541_v41 = vpop.eup %2540  ;;  %2552 = vpow2.f32 %v2299_v24  ;;  %v3982_v26 = vmul.f32 %v3843_v29, %v3792_v8  ;;  %v1593_v1 = vmul.f32 %v3921_v23, %v3845_v16  ;;  %v3989_v34 = vadd.f32 %v3837_v7, %v1535_v27 }
 0x230   : > { %v2543_v15 = vpop.eup %2542  ;;  %2554 = vrcp.f32 %v3913_v17  ;;  %4910 = vst [vmem:[#allocation19_spill] sm:$0xff] %v3972_v21  ;;  %v3994_v37 = vadd.f32 1.0, %v3869_v55  ;;  %v1603_v12 = vand.u32 2147483648, %v3845_v16  ;;  %v1565_v20 = vmul.f32 %v3857_v19, %v1564_v58 }
 0x231   : > { %v3956_v48 = vpop.eup %2544  ;;  %2556 = vrcp.f32 %v3917_v43  ;;  %v3968_v46 = vadd.f32 1.0, %v2543_v15  ;;  %4911 = vst [vmem:[#allocation15_spill] sm:$0xff] %v3982_v26  ;;  %v2303_v42 = vmul.f32 -1.442695, %v3762_v36  ;;  %v4005_v6 = vmul.f32 %v3877_v18, %v3812_v56 }
 0x232   : > { %v2547_v61 = vpop.eup %2546  ;;  %2558 = vrcp.f32 %v3924_v11  ;;  %v590_v10 = vpop.f32.mrf.mxu2  ;;  %v1623_v35 = vmul.f32 %v3956_v48, %v3873_v2  ;;  %4912 = vst [vmem:[#allocation8_spill] sm:$0xff] %v3989_v34  ;;  %v4008_v15 = vmul.f32 %v3829_v49, %v1519_v14  ;;  %v4012_v27 = vadd.f32 1.0, %v2541_v41 }
 0x233   : > { %v2549_v44 = vpop.eup %2548  ;;  %2560 = vrcp.f32 %v3941_v5  ;;  %v2312_v25 = vmul.f32 -1.442695, %v590_v10  ;;  %4913 = vst [vmem:[#allocation22_spill] sm:$0xff] %v4005_v6  ;;  %v4915_v36 = vmov 0  ;;  %v4037_v39 = vor.u32 1.1754944e-38, %v1603_v12 }
 0x234   : > { %v3974_v24 = vpop.eup %2550  ;;  %2562 = vrcp.f32 %v3949_v62  ;;  %v3978_v51 = vadd.f32 1.0, %v2549_v44  ;;  %4914 = vst [vmem:[#allocation10_spill] sm:$0xff] %v4008_v15  ;;  %v4916_v36 = vsel %vm4020_vm13, 4294967295, %v4915_v36  ;;  %v4027_v44 = vadd.f32 1.0, %v2547_v61 }
 0x235   : > { %v2553_v50 = vpop.eup %2552  ;;  %2564 = vpow2.f32 %v2312_v25  ;;  %v1653_v10 = vmul.f32 %v3974_v24, %v3904_v3  ;;  %4917 = vst [vmem:[#allocation26_spill] sm:$0xff] %v4916_v36  ;;  %v1624_v41 = vsub.f32 1.0, %v1623_v35  ;;  %v1594_v25 = vsub.f32 1.0, %v1593_v1 }
 0x236   : > { %v3991_v40 = vpop.eup %2554  ;;  %2566 = vrcp.f32 %v3978_v51  ;;  %4918 = vst [vmem:[#allocation2_spill] sm:$0xff] %v4037_v39  ;;  %v4040_v58 = vadd.f32 %v3857_v19, %v1565_v20  ;;  %v4042_v57 = vadd.f32 1.0, %v2553_v50  ;;  %v703_v50 = vpop.f32.mrf.mxu3  ;;  %v2305_v49 = vmul.f32 -1.442695, %v3779_v13 }
 0x237   : > { %v3999_v22 = vpop.eup %2556  ;;  %2568 = vrcp.f32 %v3968_v46  ;;  %v1683_v12 = vmul.f32 %v3991_v40, %v3913_v17  ;;  %v1654_v33 = vsub.f32 1.0, %v1653_v10  ;;  %v4059_v1 = vmul.f32 %v3956_v48, %v1624_v41 }
 0x238   : > { %v4010_v55 = vpop.eup %2558  ;;  %2570 = vpow2.f32 %v2301_v45  ;;  %v4062_v35 = vmul.f32 %v3921_v23, %v1594_v25  ;;  %v1713_v38 = vmul.f32 %v3999_v22, %v3917_v43  ;;  %v2313_v0 = vmul.f32 -1.442695, %v703_v50 }
 0x239   : > { %v4025_v14 = vpop.eup %2560  ;;  %2572 = vrcp.f32 %v3994_v37  ;;  %v1743_v10 = vmul.f32 %v4010_v55, %v3924_v11  ;;  %v1684_v8 = vsub.f32 1.0, %v1683_v12  ;;  %v4081_v56 = vmul.f32 %v3974_v24, %v1654_v33 }
 0x23a   : > { %v4033_v47 = vpop.eup %2562  ;;  %2574 = vpow2.f32 %v2303_v42  ;;  %v1773_v25 = vmul.f32 %v4025_v14, %v3941_v5  ;;  %v2307_v13 = vmul.f32 -1.442695, %v3819_v30  ;;  %v2311_v6 = vmul.f32 -1.442695, %v3970_v4 }
 0x23b   : > { %v2565_v61 = vpop.eup %2564  ;;  %2576 = vrcp.f32 %v4012_v27  ;;  %v1833_v41 = vmul.f32 %v4033_v47, %v3949_v62  ;;  %v1744_v50 = vsub.f32 1.0, %v1743_v10  ;;  %v1714_v21 = vsub.f32 1.0, %v1713_v38 }
 0x23c   : > { %v4046_v45 = vpop.eup %2566  ;;  %v4049_v63 = vadd.f32 1.0, %v2565_v61  ;;  %2578 = vrcp.f32 %v4027_v44  ;;  %v2309_v33 = vmul.f32 -1.442695, %v3885_v52  ;;  %v1774_v26 = vsub.f32 1.0, %v1773_v25 }
 0x23d   : > { %v4053_v20 = vpop.eup %2568  ;;  %v1863_v42 = vmul.f32 %v4046_v45, %v3978_v51  ;;  %v4097_v32 = vmul.f32 %v3991_v40, %v1684_v8  ;;  %vm1807_vm7 = vweird.f32 %v3968_v46  ;;  %vm1778_vm3 = vweird.f32 %v4025_v14 }
 0x23e   : > { %v2571_v61 = vpop.eup %2570  ;;  %2580 = vrcp.f32 %v4049_v63  ;;  %v1803_v60 = vmul.f32 %v4053_v20, %v3968_v46  ;;  %vm1868_vm15 = vweird.f32 %v4046_v45  ;;  %vm1808_vm8 = vweird.f32 %v4053_v20 }
 0x23f   : > { %2582 = vrcp.f32 %v4042_v57  ;;  %v4076_v15 = vpop.eup %2572  ;;  %v4083_v54 = vadd.f32 1.0, %v2571_v61  ;;  %v1864_v59 = vsub.f32 1.0, %v1863_v42  ;;  %v1834_v61 = vsub.f32 1.0, %v1833_v41 }
 0x240   : > { %v2575_v31 = vpop.eup %2574  ;;  %2584 = vpow2.f32 %v2305_v49  ;;  %v1804_v42 = vsub.f32 1.0, %v1803_v60  ;;  %v1775_v41 = vmul.f32 %v4025_v14, %v1774_v26  ;;  %vm1777_vm12 = vweird.f32 %v3941_v5 }
 0x241   : > { %v4087_v18 = vpop.eup %2576  ;;  %v4094_v30 = vadd.f32 1.0, %v2575_v31  ;;  %2586 = vpow2.f32 %v2313_v0  ;;  %v1865_v10 = vmul.f32 %v4046_v45, %v1864_v59  ;;  %v4106_v31 = vmul.f32 %v4010_v55, %v1744_v50 }
 0x242   : > { %v4091_v12 = vpop.eup %2578  ;;  %2588 = vpow2.f32 %v2307_v13  ;;  %v4109_v0 = vmul.f32 %v3999_v22, %v1714_v21  ;;  %v1835_v8 = vmul.f32 %v4033_v47, %v1834_v61  ;;  %v1903_v59 = vand.u32 2147483648, %v4049_v63 }
 0x243   : > { %2590 = vpow2.f32 %v2311_v6  ;;  %v1805_v6 = vmul.f32 %v4053_v20, %v1804_v42  ;;  %v1901_v13 = vand.u32 2147483647, %v4049_v63  ;;  %v1866_v50 = vadd.f32 %v4046_v45, %v1865_v10 }
 0x244   : > { %v2581_v28 = vpop.eup %2580  ;;  %2592 = vpow2.f32 %v2309_v33  ;;  %vm1748_vm1 = vweird.f32 %v4010_v55  ;;  %vm1867_vm14 = vweird.f32 %v3978_v51  ;;  %v1873_v33 = vand.u32 2147483648, %v3978_v51 }
 0x245   : > { %v4099_v4 = vpop.eup %2582  ;;  %v1893_v38 = vmul.f32 %v2581_v28, %v4049_v63  ;;  %vm1898_vm9 = vweird.f32 %v2581_v28  ;;  %vm1837_vm4 = vweird.f32 %v3949_v62  ;;  %vm1838_vm2 = vweird.f32 %v4033_v47  ;;  %vm4132_vm6 = vmor %vm1867_vm14, %vm1868_vm15 }
 0x246   : > { %v4119_v21 = vpop.eup %2584  ;;  %vm1897_vm5 = vweird.f32 %v4049_v63  ;;  %v1871_v10 = vand.u32 2147483647, %v3978_v51  ;;  %vm1747_vm11 = vweird.f32 %v3924_v11  ;;  %vm1718_vm0 = vweird.f32 %v3999_v22 }
 0x247   : > { %v1894_v60 = vsub.f32 1.0, %v1893_v38  ;;  %v2587_v26 = vpop.eup %2586  ;;  %vm1899_vm10 = vmor %vm1897_vm5, %vm1898_vm9  ;;  %v1841_v63 = vand.u32 2147483647, %v3949_v62  ;;  %v1843_v49 = vand.u32 2147483648, %v3949_v62  ;;  %v1806_v52 = vadd.f32 %v4053_v20, %v1805_v6 }
 0x248   : > { %v2589_v61 = vpop.eup %2588  ;;  %v4144_v7 = vadd.f32 1.0, %v2587_v26  ;;  %vm1902_vm15 = vcmp.eq.f32.partialorder %v1901_v13, 8.507059e+37  ;;  %vm1717_vm14 = vweird.f32 %v3917_v43  ;;  %vm1688_vm9 = vweird.f32 %v3991_v40  ;;  %vm4157_vm5 = vmor %vm1837_vm4, %vm1838_vm2 }
 0x249   : > { %v1895_v25 = vmul.f32 %v2581_v28, %v1894_v60  ;;  %v1836_v60 = vadd.f32 %v4033_v47, %v1835_v8  ;;  %v2591_v29 = vpop.eup %2590  ;;  %v1870_v8 = vsel %vm4132_vm6, %v4046_v45, %v1866_v50  ;;  %v1874_v39 = vor.u32 1.1754944e-38, %v1873_v33 }
 0x24a   : > { %v2593_v34 = vpop.eup %2592  ;;  %v1813_v45 = vand.u32 2147483648, %v3968_v46  ;;  %v4164_v13 = vadd.f32 1.0, %v2591_v29  ;;  %vm1872_vm6 = vcmp.eq.f32.partialorder %v1871_v10, 8.507059e+37  ;;  %v1776_v62 = vadd.f32 %v4025_v14, %v1775_v41 }
 0x24b   : > { %v1896_v42 = vadd.f32 %v2581_v28, %v1895_v25  ;;  %v1904_v25 = vor.u32 1.1754944e-38, %v1903_v59  ;;  %v4151_v59 = vpop.f32.mrf.mxu0  ;;  %v1840_v50 = vsel %vm4157_vm5, %v4033_v47, %v1836_v60  ;;  %vm1687_vm4 = vweird.f32 %v3913_v17  ;;  %vm4197_vm5 = vmor %vm1777_vm12, %vm1778_vm3 }
 0x24c   : > { %1992 = vmatmul.f32.vlgmr.msrb.gmra.mxu0 %v4151_v59  ;;  %vm1658_vm2 = vweird.f32 %v3974_v24  ;;  %v1875_v26 = vsel %vm1872_vm6, %v1874_v39, %v1870_v8  ;;  %v1844_v33 = vor.u32 1.1754944e-38, %v1843_v49  ;;  %v1746_v47 = vadd.f32 %v4010_v55, %v4106_v31  ;;  %vm4218_vm12 = vmor %vm1747_vm11, %vm1748_vm1 }
 0x24d   : > { %v1900_v51 = vsel %vm1899_vm10, %v2581_v28, %v1896_v42  ;;  %v1811_v28 = vand.u32 2147483647, %v3968_v46  ;;  %vm4176_vm10 = vmor %vm1807_vm7, %vm1808_vm8  ;;  %v4183_v41 = vadd.f32 1.0, %v2593_v34  ;;  %2594 = vrcp.f32 %v4144_v7 }
 0x24e   : > { %v1905_v36 = vsel %vm1902_vm15, %v1904_v25, %v1900_v51  ;;  %vm1842_vm15 = vcmp.eq.f32.partialorder %v1841_v63, 8.507059e+37  ;;  %v1810_v39 = vsel %vm4176_vm10, %v4053_v20, %v1806_v52  ;;  %vm1657_vm7 = vweird.f32 %v3904_v3  ;;  %vm4237_vm11 = vmor %vm1717_vm14, %vm1718_vm0 }
 0x24f   : > { %1999 = vmatpush.msrb.mxu1 %v1905_v36  ;;  %v1783_v36 = vand.u32 2147483648, %v3941_v5  ;;  %vm1628_vm8 = vweird.f32 %v3956_v48  ;;  %v4191_v46 = vadd.f32 1.0, %v2589_v61  ;;  %v1845_v49 = vsel %vm1842_vm15, %v1844_v33, %v1840_v50  ;;  %vm4260_vm0 = vmor %vm1687_vm4, %vm1688_vm9 }
 0x250   : > { %v1814_v42 = vor.u32 1.1754944e-38, %v1813_v45  ;;  %v1753_v31 = vand.u32 2147483648, %v3924_v11  ;;  %2596 = vrcp.f32 %v4164_v13  ;;  %vm1812_vm6 = vcmp.eq.f32.partialorder %v1811_v28, 8.507059e+37  ;;  %vm4289_vm4 = vmor %vm1657_vm7, %vm1658_vm2 }
 0x251   : > { %2000 = vmatpush.msrb.mxu1 %v1875_v26  ;;  %v1780_v20 = vsel %vm4197_vm5, %v4025_v14, %v1776_v62  ;;  %v1716_v52 = vadd.f32 %v3999_v22, %v4109_v0  ;;  %vm1627_vm10 = vweird.f32 %v3873_v2  ;;  %vm1598_vm3 = vweird.f32 %v3921_v23 }
 0x252   : > { %2598 = vrcp.f32 %v4083_v54  ;;  %v4212_v61 = vadd.f32 1.0, %v4119_v21  ;;  %v1815_v38 = vsel %vm1812_vm6, %v1814_v42, %v1810_v39  ;;  %v1784_v10 = vor.u32 1.1754944e-38, %v1783_v36  ;;  %vm4323_vm7 = vmor %vm1627_vm10, %vm1628_vm8 }
 0x253   : > { %2001 = vmatpush.msrb.mxu1 %v1845_v49  ;;  %vm1568_vm15 = vweird.f32 %v3857_v19  ;;  %2600 = vrcp.f32 %v4183_v41  ;;  %v4929_v0 = vand.u32 2147483647, %v3941_v5  ;;  %v1750_v21 = vsel %vm4218_vm12, %v4010_v55, %v1746_v47  ;;  %v4243_v55 = vpop.eup %2594  ;;  %v4964_v47 = vld [vmem:[#allocation7_spill] sm:$0xff] }
 0x254   : > { %v1686_v60 = vadd.f32 %v3991_v40, %v4097_v32  ;;  %vm1597_vm1 = vweird.f32 %v3845_v16  ;;  %2602 = vrcp.f32 %v4191_v46  ;;  %v1754_v63 = vor.u32 1.1754944e-38, %v1753_v31  ;;  %v4968_v31 = vld [vmem:[#allocation6_spill] sm:$0xff] }
 0x255   : > { %2002 = vmatpush.msrb.mxu1 %v1815_v38  ;;  %vm1782_vm5 = vcmp.eq.f32.partialorder %v4929_v0, 8.507059e+37  ;;  %v1693_v51 = vand.u32 2147483648, %v3913_v17  ;;  %vm1567_vm6 = vweird.f32 %v3801_v9  ;;  %2604 = vrcp.f32 %v4094_v30  ;;  %vm4346_vm8 = vmor %vm1597_vm1, %vm1598_vm3 }
 0x256   : > { %v1785_v25 = vsel %vm1782_vm5, %v1784_v10, %v1780_v20  ;;  %v4932_v32 = vand.u32 2147483647, %v3924_v11  ;;  %v1720_v8 = vsel %vm4237_vm11, %v3999_v22, %v1716_v52  ;;  %v1656_v6 = vadd.f32 %v3974_v24, %v4081_v56  ;;  %v4265_v22 = vpop.eup %2596  ;;  %vm4361_vm3 = vmor %vm1567_vm6, %vm1568_vm15 }
 0x257   : > { %2003 = vmatpush.msrb.mxu1 %v1785_v25  ;;  %2606 = vrcp.f32 %v4212_v61  ;;  %v4933_v45 = vand.u32 2147483648, %v3917_v43  ;;  %v1663_v62 = vand.u32 2147483648, %v3904_v3  ;;  %v4936_v56 = vand.u32 2147483647, %v3917_v43 }
 0x258   : > { %vm1752_vm12 = vcmp.eq.f32.partialorder %v4932_v32, 8.507059e+37  ;;  %v1690_v26 = vsel %vm4260_vm0, %v3991_v40, %v1686_v60  ;;  %v1661_v33 = vand.u32 2147483647, %v3904_v3  ;;  %v1626_v29 = vadd.f32 %v3956_v48, %v4059_v1  ;;  %v4281_v39 = vpop.eup %2598 }
 0x259   : > { %v1755_v28 = vsel %vm1752_vm12, %v1754_v63, %v1750_v21  ;;  %v1724_v50 = vor.u32 1.1754944e-38, %v4933_v45  ;;  %vm1722_vm14 = vcmp.eq.f32.partialorder %v4936_v56, 8.507059e+37  ;;  %v4937_v36 = vand.u32 2147483647, %v3845_v16  ;;  %v4300_v20 = vpop.eup %2600 }
 0x25a   : > { %2004 = vmatpush.msrb.mxu1 %v1755_v28  ;;  %v1908_v43 = vmul.f32 %v4243_v55, %v4144_v7  ;;  %v1694_v42 = vor.u32 1.1754944e-38, %v1693_v51  ;;  %v1631_v1 = vand.u32 2147483647, %v3873_v2  ;;  %v4942_v34 = vand.u32 2147483647, %v3789_v53  ;;  %v4317_v21 = vpop.eup %2602 }
 0x25b   : > { %vm4277_vm9 = vcmp.eq.f32.partialorder %v4937_v36, 8.507059e+37  ;;  %v1725_v49 = vsel %vm1722_vm14, %v1724_v50, %v1720_v8  ;;  %v4945_v52 = vand.u32 2147483647, %v3913_v17  ;;  %v1660_v3 = vsel %vm4289_vm4, %v3974_v24, %v1656_v6  ;;  %v4331_v63 = vpop.eup %2604  ;;  %v4365_v11 = vpop.f32.mrf.mxu0 }
 0x25c   : > { %vm4296_vm5 = vcmp.eq.f32.partialorder %v4942_v34, 8.507059e+37  ;;  %2005 = vmatpush.msrb.mxu1 %v1725_v49  ;;  %v4946_v38 = vand.u32 2147483648, %v3873_v2  ;;  %v1596_v53 = vadd.f32 %v3921_v23, %v4062_v35  ;;  %v4947_v14 = vand.u32 2147483647, %v3801_v9  ;;  %1995 = vmatmul.f32.gmra.mxu0 %v4365_v11 }
 0x25d   : > { %vm1692_vm11 = vcmp.eq.f32.partialorder %v4945_v52, 8.507059e+37  ;;  %v1664_v60 = vor.u32 1.1754944e-38, %v1663_v62  ;;  %v1878_v35 = vmul.f32 %v4265_v22, %v4164_v13  ;;  %v1608_v25 = vmul.f32 %v4076_v15, %v3994_v37  ;;  %v4340_v32 = vpop.eup %2606  ;;  %v4958_v52 = vld [vmem:[#allocation13_spill] sm:$0xff] }
 0x25e   : > { %v1634_v10 = vor.u32 1.1754944e-38, %v4946_v38  ;;  %vm4313_vm2 = vcmp.eq.f32.partialorder %v4947_v14, 8.507059e+37  ;;  %v1695_v17 = vsel %vm1692_vm11, %v1694_v42, %v1690_v26  ;;  %vm1662_vm12 = vcmp.eq.f32.partialorder %v1661_v33, 8.507059e+37  ;;  %v4956_v42 = vld [vmem:[#allocation2_spill] sm:$0xff] }
 0x25f   : > { %2006 = vmatpush.msrb.mxu1 %v1695_v17  ;;  %v1630_v5 = vsel %vm4323_vm7, %v3956_v48, %v1626_v29  ;;  %v1668_v2 = vmul.f32 %v4091_v12, %v4027_v44  ;;  %v1638_v51 = vmul.f32 %v4087_v18, %v4012_v27  ;;  %v1665_v8 = vsel %vm1662_vm12, %v1664_v60, %v1660_v3  ;;  %v4959_v3 = vld [vmem:[#allocation8_spill] sm:$0xff]  ;;  %v4962_v60 = vld [vmem:[#allocation15_spill] sm:$0xff] }
 0x260   : > { %v1909_v28 = vsub.f32 1.0, %v1908_v43  ;;  %v1848_v48 = vmul.f32 %v4300_v20, %v4183_v41  ;;  %v1698_v45 = vmul.f32 %v4099_v4, %v4042_v57  ;;  %vm1632_vm10 = vcmp.eq.f32.partialorder %v1631_v1, 8.507059e+37 }
 0x261   : > { %2007 = vmatpush.msrb.mxu1 %v1665_v8  ;;  %v1600_v50 = vsel %vm4346_vm8, %v3921_v23, %v1596_v53  ;;  %v1818_v62 = vmul.f32 %v4317_v21, %v4191_v46  ;;  %v1728_v56 = vmul.f32 %v4281_v39, %v4083_v54  ;;  %v1635_v26 = vsel %vm1632_vm10, %v1634_v10, %v1630_v5  ;;  %v4961_v10 = vld [vmem:[#allocation3_spill] sm:$0xff]  ;;  %v4966_v8 = vld [vmem:[#allocation22_spill] sm:$0xff] }
 0x262   : > { %v1570_v23 = vsel %vm4361_vm3, %v3857_v19, %v4040_v58  ;;  %v1879_v33 = vsub.f32 1.0, %v1878_v35  ;;  %v1609_v9 = vsub.f32 1.0, %v1608_v25  ;;  %v1788_v29 = vmul.f32 %v4340_v32, %v4212_v61  ;;  %v4965_v25 = vld [vmem:[#allocation19_spill] sm:$0xff] }
 0x263   : > { %2008 = vmatpush.msrb.mxu1 %v1635_v26  ;;  %v1758_v36 = vmul.f32 %v4331_v63, %v4094_v30  ;;  %v1669_v43 = vsub.f32 1.0, %v1668_v2  ;;  %v1639_v49 = vsub.f32 1.0, %v1638_v51  ;;  %v1605_v40 = vsel %vm4277_vm9, %v4956_v42, %v1600_v50 }
 0x264   : > { %v1910_v1 = vmul.f32 %v4243_v55, %v1909_v28  ;;  %v1849_v19 = vsub.f32 1.0, %v1848_v48  ;;  %v1699_v58 = vsub.f32 1.0, %v1698_v45  ;;  %v4960_v38 = vsel %vm4020_vm13, %v4958_v52, %v4959_v3  ;;  %2038 = vmatmul.f32.vlgmr.msra.gmra.mxu0 %v4151_v59 }
 0x265   : > { %2009 = vmatpush.msrb.mxu1 %v1605_v40  ;;  %v1545_v53 = vsel %vm4296_vm5, %v4961_v10, %v4960_v38  ;;  %v1819_v14 = vsub.f32 1.0, %v1818_v62  ;;  %v1729_v17 = vsub.f32 1.0, %v1728_v56  ;;  %v4963_v24 = vsub.f32 1.0, %v4962_v60  ;;  %v4975_v10 = vld [vmem:[#allocation21_spill] sm:$0xff] }
 0x266   : > { %v1575_v5 = vsel %vm4313_vm2, %v4965_v25, %v1570_v23  ;;  %v1880_v2 = vmul.f32 %v4265_v22, %v1879_v33  ;;  %v4402_v51 = vmul.f32 %v4076_v15, %v1609_v9  ;;  %v4967_v6 = vsub.f32 1.0, %v4966_v8 }
 0x267   : > { %v4395_v35 = vmul.f32 %v4964_v47, %v4963_v24  ;;  %2010 = vmatpush.msrb.mxu1 %v1575_v5  ;;  %v1789_v48 = vsub.f32 1.0, %v1788_v29  ;;  %v1759_v45 = vsub.f32 1.0, %v1758_v36  ;;  %v4410_v50 = vmul.f32 %v4091_v12, %v1669_v43  ;;  %v4969_v36 = vld [vmem:[#allocation24_spill] sm:$0xff] }
 0x268   : > { %v4407_v28 = vmul.f32 %v4968_v31, %v4967_v6  ;;  %v4413_v16 = vmul.f32 %v4087_v18, %v1639_v49  ;;  %v1911_v0 = vadd.f32 %v4243_v55, %v1910_v1  ;;  %vm1913_vm13 = vweird.f32 %v4243_v55 }
 0x269   : > { %v1850_v62 = vmul.f32 %v4300_v20, %v1849_v19  ;;  %v4419_v56 = vmul.f32 %v4099_v4, %v1699_v58  ;;  %2011 = vmatpush.msrb.mxu1 %v1545_v53  ;;  %v1918_v26 = vand.u32 2147483648, %v4144_v7  ;;  %v1820_v23 = vmul.f32 %v4317_v21, %v1819_v14  ;;  %v4451_v19 = vpop.f32.mrf.mxu1  ;;  %v4972_v58 = vld [vmem:[#allocation4_spill] sm:$0xff] }
 0x26a   : > { %vm1822_vm15 = vweird.f32 %v4191_v46  ;;  %v4425_v33 = vmul.f32 %v4281_v39, %v1729_v17  ;;  %vm1912_vm1 = vweird.f32 %v4144_v7  ;;  %v1916_v9 = vand.u32 2147483647, %v4144_v7  ;;  %v2610_v17 = vld [vmem:[%s2689_s25 + $0x8] sm:$0xff] }
 0x26b   : > { %v1881_v29 = vadd.f32 %v4265_v22, %v1880_v2  ;;  %vm1883_vm6 = vweird.f32 %v4265_v22  ;;  %vm1792_vm0 = vweird.f32 %v4212_v61  ;;  %2012 = vmatpush.msrb.mxu1 %v4969_v36  ;;  %vm4436_vm14 = vmor %vm1912_vm1, %vm1913_vm13  ;;  %vm1882_vm9 = vweird.f32 %v4164_v13 }
 0x26c   : > { %v1888_v7 = vand.u32 2147483648, %v4164_v13  ;;  %v1790_v49 = vmul.f32 %v4340_v32, %v1789_v48  ;;  %v1760_v42 = vmul.f32 %v4331_v63, %v1759_v45  ;;  %v1915_v59 = vsel %vm4436_vm14, %v4243_v55, %v1911_v0  ;;  %vm4456_vm11 = vmor %vm1882_vm9, %vm1883_vm6  ;;  %2041 = vmatmul.f32.gmra.mxu0 %v4365_v11 }
 0x26d   : > { %v1886_v40 = vand.u32 2147483647, %v4164_v13  ;;  %v1851_v1 = vadd.f32 %v4300_v20, %v1850_v62  ;;  %vm1853_vm4 = vweird.f32 %v4300_v20  ;;  %vm1762_vm5 = vweird.f32 %v4094_v30  ;;  %2013 = vmatpush.msrb.mxu1 %v4972_v58 }
 0x26e   : > { %v1919_v34 = vor.u32 1.1754944e-38, %v1918_v26  ;;  %vm1852_vm2 = vweird.f32 %v4183_v41  ;;  %v1856_v13 = vand.u32 2147483647, %v4183_v41  ;;  %v1858_v55 = vand.u32 2147483648, %v4183_v41 }
 0x26f   : > { %vm1917_vm7 = vcmp.eq.f32.partialorder %v1916_v9, 8.507059e+37  ;;  %v1885_v3 = vsel %vm4456_vm11, %v4265_v22, %v1881_v29  ;;  %v1821_v38 = vadd.f32 %v4317_v21, %v1820_v23  ;;  %vm1823_vm12 = vweird.f32 %v4317_v21  ;;  %2014 = vmatpush.msrb.mxu1 %v4975_v10  ;;  %vm4472_vm10 = vmor %vm1852_vm2, %vm1853_vm4 }
 0x270   : > { %vm1732_vm8 = vweird.f32 %v4083_v54  ;;  %v1920_v53 = vsel %vm1917_vm7, %v1919_v34, %v1915_v59  ;;  %v1889_v14 = vor.u32 1.1754944e-38, %v1888_v7  ;;  %v1826_v41 = vand.u32 2147483647, %v4191_v46  ;;  %vm4488_vm6 = vmor %vm1822_vm15, %vm1823_vm12  ;;  %2015 = vmatmul.f32.vlgmr.msrb.gmra.mxu1 %v4451_v19 }
 0x271   : > { %v1828_v22 = vand.u32 2147483648, %v4191_v46  ;;  %2045 = vmatpush.msra.mxu1 %v1920_v53  ;;  %vm1887_vm3 = vcmp.eq.f32.partialorder %v1886_v40, 8.507059e+37  ;;  %v1855_v60 = vsel %vm4472_vm10, %v4300_v20, %v1851_v1  ;;  %v1791_v24 = vadd.f32 %v4340_v32, %v1790_v49  ;;  %v5009_v49 = vld [vmem:[#allocation12_spill] sm:$0xff] }
 0x272   : > { %vm1793_vm13 = vweird.f32 %v4340_v32  ;;  %vm1702_vm1 = vweird.f32 %v4042_v57  ;;  %v1890_v25 = vsel %vm1887_vm3, %v1889_v14, %v1885_v3  ;;  %v1859_v5 = vor.u32 1.1754944e-38, %v1858_v55 }
 0x273   : > { %v1796_v8 = vand.u32 2147483647, %v4212_v61  ;;  %v1798_v20 = vand.u32 2147483648, %v4212_v61  ;;  %2046 = vmatpush.msra.mxu1 %v1890_v25  ;;  %vm1857_vm14 = vcmp.eq.f32.partialorder %v1856_v13, 8.507059e+37  ;;  %v1825_v6 = vsel %vm4488_vm6, %v4317_v21, %v1821_v38  ;;  %vm4506_vm4 = vmor %vm1792_vm0, %vm1793_vm13 }
 0x274   : > { %v1761_v48 = vadd.f32 %v4331_v63, %v1760_v42  ;;  %vm1763_vm9 = vweird.f32 %v4331_v63  ;;  %vm1672_vm15 = vweird.f32 %v4027_v44  ;;  %v1860_v46 = vsel %vm1857_vm14, %v1859_v5, %v1855_v60 }
 0x275   : > { %v1829_v45 = vor.u32 1.1754944e-38, %v1828_v22  ;;  %v1766_v21 = vand.u32 2147483647, %v4094_v30  ;;  %v1768_v62 = vand.u32 2147483648, %v4094_v30  ;;  %2047 = vmatpush.msra.mxu1 %v1860_v46  ;;  %vm1827_vm11 = vcmp.eq.f32.partialorder %v1826_v41, 8.507059e+37  ;;  %vm4523_vm7 = vmor %vm1762_vm5, %vm1763_vm9  ;;  %v4536_v30 = vpop.f32.mrf.mxu1  ;;  %v5001_v46 = vld [vmem:[#allocation14_spill] sm:$0xff] }
 0x276   : > { %v1795_v11 = vsel %vm4506_vm4, %v4340_v32, %v1791_v24  ;;  %v1731_v26 = vadd.f32 %v4281_v39, %v4425_v33  ;;  %vm1733_vm2 = vweird.f32 %v4281_v39  ;;  %vm1642_vm0 = vweird.f32 %v4012_v27 }
 0x277   : > { %v1830_v61 = vsel %vm1827_vm11, %v1829_v45, %v1825_v6  ;;  %v1799_v23 = vor.u32 1.1754944e-38, %v1798_v20  ;;  %v1736_v29 = vand.u32 2147483647, %v4083_v54  ;;  %v1738_v32 = vand.u32 2147483648, %v4083_v54  ;;  %vm4542_vm3 = vmor %vm1732_vm8, %vm1733_vm2  ;;  %v4986_v54 = vld [vmem:[#allocation20_spill] sm:$0xff] }
 0x278   : > { %2048 = vmatpush.msra.mxu1 %v1830_v61  ;;  %vm1797_vm12 = vcmp.eq.f32.partialorder %v1796_v8, 8.507059e+37  ;;  %v1765_v33 = vsel %vm4523_vm7, %v4331_v63, %v1761_v48  ;;  %v1701_v36 = vadd.f32 %v4099_v4, %v4419_v56  ;;  %vm1703_vm10 = vweird.f32 %v4099_v4  ;;  %v5004_v61 = vld [vmem:[#allocation9_spill] sm:$0xff] }
 0x279   : > { %vm1612_vm5 = vweird.f32 %v3994_v37  ;;  %v1800_v43 = vsel %vm1797_vm12, %v1799_v23, %v1795_v11  ;;  %v1769_v7 = vor.u32 1.1754944e-38, %v1768_v62  ;;  %v1706_v63 = vand.u32 2147483647, %v4042_v57  ;;  %vm4559_vm14 = vmor %vm1702_vm1, %vm1703_vm10  ;;  %2018 = vmatmul.f32.gmra.mxu1 %v4536_v30  ;;  %v5005_v23 = vld [vmem:[#allocation16_spill] sm:$0xff] }
 0x27a   : > { %v1708_v56 = vand.u32 2147483648, %v4042_v57  ;;  %2049 = vmatpush.msra.mxu1 %v1800_v43  ;;  %vm1767_vm13 = vcmp.eq.f32.partialorder %v1766_v21, 8.507059e+37  ;;  %v1735_v42 = vsel %vm4542_vm3, %v4281_v39, %v1731_v26  ;;  %v1671_v59 = vadd.f32 %v4091_v12, %v4410_v50  ;;  %v4989_v57 = vld [vmem:[#allocation18_spill] sm:$0xff] }
 0x27b   : > { %vm1673_vm6 = vweird.f32 %v4091_v12  ;;  %vm1582_vm8 = vweird.f32 %v4986_v54  ;;  %v1770_v40 = vsel %vm1767_vm13, %v1769_v7, %v1765_v33  ;;  %v1739_v1 = vor.u32 1.1754944e-38, %v1738_v32  ;;  %v5008_v7 = vld [vmem:[#allocation5_spill] sm:$0xff] }
 0x27c   : > { %v1676_v34 = vand.u32 2147483647, %v4027_v44  ;;  %v1678_v39 = vand.u32 2147483648, %v4027_v44  ;;  %2050 = vmatpush.msra.mxu1 %v1770_v40  ;;  %vm1737_vm9 = vcmp.eq.f32.partialorder %v1736_v29, 8.507059e+37  ;;  %v1705_v50 = vsel %vm4559_vm14, %v4099_v4, %v1701_v36  ;;  %vm4577_vm11 = vmor %vm1672_vm15, %vm1673_vm6  ;;  %v4992_v44 = vld [vmem:[#allocation11_spill] sm:$0xff] }
 0x27d   : > { %v1641_v52 = vadd.f32 %v4087_v18, %v4413_v16  ;;  %vm1643_vm1 = vweird.f32 %v4087_v18  ;;  %vm1552_vm4 = vweird.f32 %v4989_v57  ;;  %v1740_v13 = vsel %vm1737_vm9, %v1739_v1, %v1735_v42 }
 0x27e   : > { %v1709_v55 = vor.u32 1.1754944e-38, %v1708_v56  ;;  %v1646_v38 = vand.u32 2147483647, %v4012_v27  ;;  %v1648_v4 = vand.u32 2147483648, %v4012_v27  ;;  %2051 = vmatpush.msra.mxu1 %v1740_v13  ;;  %vm1707_vm2 = vcmp.eq.f32.partialorder %v1706_v63, 8.507059e+37  ;;  %vm4594_vm12 = vmor %vm1642_vm0, %vm1643_vm1  ;;  %v4995_v27 = vld [vmem:[#allocation17_spill] sm:$0xff] }
 0x27f   : > { %v1675_v16 = vsel %vm4577_vm11, %v4091_v12, %v1671_v59  ;;  %v1611_v10 = vadd.f32 %v4076_v15, %v4402_v51  ;;  %vm1613_vm7 = vweird.f32 %v4076_v15  ;;  %vm1522_vm15 = vweird.f32 %v4992_v44  ;;  %v5010_v59 = vld [vmem:[#allocation23_spill] sm:$0xff] }
 0x280   : > { %v1710_v53 = vsel %vm1707_vm2, %v1709_v55, %v1705_v50  ;;  %v1679_v14 = vor.u32 1.1754944e-38, %v1678_v39  ;;  %v1616_v41 = vand.u32 2147483647, %v3994_v37  ;;  %v1618_v12 = vand.u32 2147483648, %v3994_v37  ;;  %vm4611_vm13 = vmor %vm1612_vm5, %vm1613_vm7  ;;  %v2608_v55 = vld [vmem:[%s2689_s25] sm:$0xff] }
 0x281   : > { %2052 = vmatpush.msra.mxu1 %v1710_v53  ;;  %vm1677_vm10 = vcmp.eq.f32.partialorder %v1676_v34, 8.507059e+37  ;;  %v1645_v51 = vsel %vm4594_vm12, %v4087_v18, %v1641_v52  ;;  %v1581_v22 = vadd.f32 %v4968_v31, %v4407_v28  ;;  %vm1583_vm3 = vweird.f32 %v4968_v31 }
 0x282   : > { %vm1492_vm0 = vweird.f32 %v4995_v27  ;;  %v1680_v60 = vsel %vm1677_vm10, %v1679_v14, %v1675_v16  ;;  %v1649_v24 = vor.u32 1.1754944e-38, %v1648_v4  ;;  %v1586_v5 = vand.u32 2147483647, %v4986_v54  ;;  %vm4625_vm5 = vmor %vm1582_vm8, %vm1583_vm3 }
 0x283   : > { %v1588_v18 = vand.u32 2147483648, %v4986_v54  ;;  %2053 = vmatpush.msra.mxu1 %v1680_v60  ;;  %vm1647_vm6 = vcmp.eq.f32.partialorder %v1646_v38, 8.507059e+37  ;;  %v1615_v28 = vsel %vm4611_vm13, %v4076_v15, %v1611_v10  ;;  %v1551_v2 = vadd.f32 %v4964_v47, %v4395_v35  ;;  %v5000_v35 = vld [vmem:[#allocation10_spill] sm:$0xff]  ;;  %v2609_v10 = vld [vmem:[%s2689_s25 + $0x10] sm:$0xff] }
 0x284   : > { %vm1553_vm14 = vweird.f32 %v4964_v47  ;;  %v1650_v37 = vsel %vm1647_vm6, %v1649_v24, %v1645_v51  ;;  %v1619_v8 = vor.u32 1.1754944e-38, %v1618_v12  ;;  %v1556_v6 = vand.u32 2147483647, %v4989_v57 }
 0x285   : > { %v1558_v48 = vand.u32 2147483648, %v4989_v57  ;;  %2054 = vmatpush.msra.mxu1 %v1650_v37  ;;  %vm1617_vm9 = vcmp.eq.f32.partialorder %v1616_v41, 8.507059e+37  ;;  %v1585_v15 = vsel %vm4625_vm5, %v4968_v31, %v1581_v22  ;;  %v1521_v45 = vadd.f32 %v5001_v46, %v5000_v35  ;;  %vm4639_vm8 = vmor %vm1552_vm4, %vm1553_vm14  ;;  %v2611_v22 = vld [vmem:[%s2689_s25 + $0x18] sm:$0xff] }
 0x286   : > { %vm1523_vm1 = vweird.f32 %v5001_v46  ;;  %v1620_v0 = vsel %vm1617_vm9, %v1619_v8, %v1615_v28  ;;  %v1589_v21 = vor.u32 1.1754944e-38, %v1588_v18  ;;  %v1526_v11 = vand.u32 2147483647, %v4992_v44 }
 0x287   : > { %v1528_v26 = vand.u32 2147483648, %v4992_v44  ;;  %2055 = vmatpush.msra.mxu1 %v1620_v0  ;;  %vm1587_vm11 = vcmp.eq.f32.partialorder %v1586_v5, 8.507059e+37  ;;  %v1555_v31 = vsel %vm4639_vm8, %v4964_v47, %v1551_v2  ;;  %v1491_v9 = vadd.f32 %v5005_v23, %v5004_v61  ;;  %vm4653_vm4 = vmor %vm1522_vm15, %vm1523_vm1 }
 0x288   : > { %vm1493_vm2 = vweird.f32 %v5005_v23  ;;  %v1590_v29 = vsel %vm1587_vm11, %v1589_v21, %v1585_v15  ;;  %v1559_v32 = vor.u32 1.1754944e-38, %v1558_v48  ;;  %v1496_v36 = vand.u32 2147483647, %v4995_v27 }
 0x289   : > { %v1498_v43 = vand.u32 2147483648, %v4995_v27  ;;  %2056 = vmatpush.msra.mxu1 %v1590_v29  ;;  %vm1557_vm7 = vcmp.eq.f32.partialorder %v1556_v6, 8.507059e+37  ;;  %v1525_v47 = vsel %vm4653_vm4, %v5001_v46, %v1521_v45  ;;  %v1461_v63 = vadd.f32 %v5009_v49, %v5008_v7  ;;  %vm1494_vm15 = vmor %vm1492_vm0, %vm1493_vm2 }
 0x28a   : > { %vm1463_vm12 = vweird.f32 %v5009_v49  ;;  %v1560_v56 = vsel %vm1557_vm7, %v1559_v32, %v1555_v31  ;;  %v1529_v42 = vor.u32 1.1754944e-38, %v1528_v26  ;;  %v1468_v54 = vand.u32 2147483648, %v5010_v59 }
 0x28b   : > { %2057 = vmatpush.msra.mxu1 %v1560_v56  ;;  %vm1527_vm10 = vcmp.eq.f32.partialorder %v1526_v11, 8.507059e+37  ;;  %v1495_v40 = vsel %vm1494_vm15, %v5005_v23, %v1491_v9  ;;  %vm1462_vm3 = vweird.f32 %v5010_v59  ;;  %v1466_v1 = vand.u32 2147483647, %v5010_v59 }
 0x28c   : > { %v1530_v58 = vsel %vm1527_vm10, %v1529_v42, %v1525_v47  ;;  %v1499_v34 = vor.u32 1.1754944e-38, %v1498_v43  ;;  %vm1464_vm13 = vmor %vm1462_vm3, %vm1463_vm12  ;;  %vm1497_vm6 = vcmp.eq.f32.partialorder %v1496_v36, 8.507059e+37  ;;  %v1469_v52 = vor.u32 1.1754944e-38, %v1468_v54 }
 0x28d   : > { %2058 = vmatpush.msra.mxu1 %v1530_v58  ;;  %v1465_v39 = vsel %vm1464_vm13, %v5009_v49, %v1461_v63  ;;  %vm1467_vm0 = vcmp.eq.f32.partialorder %v1466_v1, 8.507059e+37 }
 0x28e   : > { %v1500_v50 = vsel %vm1497_vm6, %v1499_v34, %v1495_v40  ;;  %v1470_v57 = vsel %vm1467_vm0, %v1469_v52, %v1465_v39 }
 0x28f   : > { %2059 = vmatpush.msra.mxu1 %v1500_v50 }
 0x291   : > { %2060 = vmatpush.msra.mxu1 %v1470_v57 }
 0x292   : > { %2061 = vmatmul.f32.vlgmr.msra.gmra.mxu1 %v4451_v19 }
 0x29a   : > { %2064 = vmatmul.f32.gmra.mxu1 %v4536_v30 }
 0x2c9   : > { %v1993_v13 = vpop.f32.mrf.mxu0 }
 0x2ca   : > { %v1994_v3 = vadd.f32 %v2608_v55, %v1993_v13 }
 0x2d9   : > { %v1996_v16 = vpop.f32.mrf.mxu0 }
 0x2da   : > { %v1997_v44 = vadd.f32 %v2609_v10, %v1996_v16 }
 0x2e1   : > { %v2039_v19 = vpop.f32.mrf.mxu0 }
 0x2e2   : > { %v2040_v30 = vadd.f32 %v2610_v17, %v2039_v19 }
 0x2e9   : > { %v2042_v51 = vpop.f32.mrf.mxu0 }
 0x2ea   : > { %v2043_v27 = vadd.f32 %v2611_v22, %v2042_v51 }
 0x2ed   : > { %v2016_v38 = vpop.f32.mrf.mxu1 }
 0x2ee   : > { %v2017_v4 = vadd.f32 %v2016_v38, %v1994_v3 }
 0x2f0   : > { %2068 = vst [vmem:[%s255_s10] sm:$0xff] %v2017_v4 }
 0x2f6   : > { %v2019_v53 = vpop.f32.mrf.mxu1 }
 0x2f7   : > { %v2020_v14 = vadd.f32 %v2019_v53, %v1997_v44 }
 0x2f9   : > { %2070 = vst [vmem:[%s255_s10 + $0x10] sm:$0xff] %v2020_v14 }
 0x30f   : > { %v2062_v41 = vpop.f32.mrf.mxu1 }
 0x310   : > { %v2063_v12 = vadd.f32 %v2062_v41, %v2040_v30 }
 0x312   : > { %2069 = vst [vmem:[%s255_s10 + $0x8] sm:$0xff] %v2063_v12 }
 0x317   : > { %v2065_v60 = vpop.f32.mrf.mxu1 }
 0x318   : > { %v2066_v24 = vadd.f32 %v2065_v60, %v2043_v27 }
 0x31a   : > { %2071 = vst [vmem:[%s255_s10 + $0x18] sm:$0xff] %v2066_v24 }
 0x31b PF: > { %s14_s17 = sadd.s32 1, %s2634_s17   ;;  %s5011_s15 = smov %s2630_s16 }
 0x31c   : > { %p11_p5 = scmp.ge.s32.totalorder %s14_s17, 4   ;;  %s5012_s16 = smov %s5014_s18 }
 0x31e   :  { %13 = sbr.rel (!%p11_p5) target bundleno = 2 (0x2), region = 69 }

</bundles_post_ra>
